<compile_context>
chip_gen: v7x
topology: tpu7x:2x2x1
jax: 0.10.0
libtpu: 0.0.40
codegen_flags: <defaults>
</compile_context>

<pallas_src>
import functools

import jax
import jax.numpy as jnp
from jax import lax
from jax.experimental import pallas as pl
from jax.experimental.pallas import tpu as pltpu

LANE = 128   # vreg lane width
SUB = 8      # sublanes per inner-loop iteration (one f32 vreg tile)


def _round_up(x, m):
    return ((x + m - 1) // m) * m


def _yolo_loss_kernel(inp_ref, tgt_ref, out_ref, acc_ref, *,
                      grid_sz, blk, lambda_coord, lambda_noobj, inv_bs,
                      approx_iou):
    core = pl.program_id(0)          # "parallel" partition (TensorCore on v7x)
    g = pl.program_id(1)             # column-block index within the partition

    @pl.when(g == 0)
    def _init():
        acc_ref[...] = jnp.zeros_like(acc_ref)

    f32 = jnp.float32
    each_cell = 448.0 / grid_sz
    ss = float(grid_sz * grid_sz)
    inv_ss = 1.0 / ss
    inv_s = 1.0 / float(grid_sz)
    n_sub = blk // SUB

    # Hoisted (sub-tile-invariant) lane/sublane pattern of local cell ids.
    local = (lax.broadcasted_iota(jnp.int32, (SUB, LANE), 0) * LANE +
             lax.broadcasted_iota(jnp.int32, (SUB, LANE), 1)).astype(f32)

    # First flattened cell id of this block.
    block_base = (core * pl.num_programs(1) + g) * (blk * LANE)

    def corners(x, y, w, h):
        return (jnp.clip(x - 0.5 * w, 0.0, 448.0),
                jnp.clip(y - 0.5 * h, 0.0, 448.0),
                jnp.clip(x + 0.5 * w, 0.0, 448.0),
                jnp.clip(y + 0.5 * h, 0.0, 448.0))

    def iou_fn(a, b):
        left = jnp.maximum(a[0], b[0])
        right = jnp.minimum(a[2], b[2])
        top = jnp.maximum(a[1], b[1])
        bottom = jnp.minimum(a[3], b[3])
        w = jnp.maximum(right - left, 1e-6)        # reference clamps to 1e-6
        h = jnp.maximum(bottom - top, 1e-6)
        inter = w * h
        union = ((a[2] - a[0]) * (a[3] - a[1]) +
                 (b[2] - b[0]) * (b[3] - b[1]))
        # reference divides by (union - intersection); reciprocal sits on EUP.
        return inter * pl.reciprocal(union - inter, approx=approx_iou)

    def sub_body(s, acc):
        row0 = pl.multiple_of(s * SUB, SUB)

        def pf(c):                                  # (8,128) predicted field c
            return inp_ref[c, pl.ds(row0, SUB), :].astype(f32)

        def tf(c):                                  # (8,128) target field c
            return tgt_ref[c, pl.ds(row0, SUB), :].astype(f32)

        # Load each box/conf field exactly once (ref loads are not CSE'd).
        px = [pf(c) for c in range(10)]   # pred x1 y1 w1 h1 c1 x2 y2 w2 h2 c2
        tg = [tf(c) for c in range(9)]    # tgt  x1 y1 w1 h1 c1 x2 y2 w2 h2

        # ---- per-column cell offsets (scalar base + hoisted iota pattern) --
        nf = (block_base + s * (SUB * LANE)).astype(f32) + local
        # n -> (vertical cell i, horizontal cell j); exact for n < 2**20
        # (asserted in the wrapper): the +0.5 bias keeps floor() exact.
        b_idx = jnp.floor((nf + 0.5) * inv_ss)
        cell = nf - b_idx * ss                      # n mod S*S
        i_cell = jnp.floor((cell + 0.5) * inv_s)
        j_cell = cell - i_cell * float(grid_sz)
        h_off = j_cell * each_cell                  # horizontal (x) offset, px
        v_off = i_cell * each_cell                  # vertical   (y) offset, px

        def box(fields, base):
            x = fields[base + 0] * each_cell + h_off
            y = fields[base + 1] * each_cell + v_off
            w = fields[base + 2] * 448.0
            h = fields[base + 3] * 448.0
            return corners(x, y, w, h)

        # IoU of both predicted boxes vs the matching target boxes; box 1 is
        # fully consumed before box 2 is built so its corner vregs die early.
        iou1 = iou_fn(box(px, 0), box(tg, 0))
        iou2 = iou_fn(box(px, 5), box(tg, 5))
        use_box2 = iou1 < iou2                      # mask `m` in the reference
        iou = jnp.where(use_box2, iou2, iou1)

        has_obj = tg[4] > 0.0
        obj = has_obj.astype(f32)
        noobj = 1.0 - obj

        # "responsible" predicted box (raw, un-rescaled, as in the reference)
        sx = jnp.where(use_box2, px[5], px[0])
        sy = jnp.where(use_box2, px[6], px[1])
        sw = jnp.where(use_box2, px[7], px[2])
        sh = jnp.where(use_box2, px[8], px[3])
        sc = jnp.where(use_box2, px[9], px[4])

        # no-object confidence error: raw confidences of BOTH predicted boxes
        noobj_term = noobj * (px[4] * px[4] + px[9] * px[9])

        coord_term = obj * ((sx - tg[0]) ** 2 + (sy - tg[1]) ** 2)

        # keep sqrt NaN-free on rows without objects (object rows match the
        # reference bit-for-bit, including a NaN for negative predicted w/h)
        safe = lambda v: jnp.where(has_obj, v, 1.0)
        size_term = obj * ((jnp.sqrt(safe(sw)) - jnp.sqrt(safe(tg[2]))) ** 2 +
                           (jnp.sqrt(safe(sh)) - jnp.sqrt(safe(tg[3]))) ** 2)

        conf_term = obj * (sc - iou) ** 2

        partial = (lambda_coord * (coord_term + size_term) + conf_term +
                   lambda_noobj * noobj_term)

        # classification error: balanced pairwise add tree (log2 depth) over
        # the 20 squared class differences.
        sq = []
        for c in range(20):
            d = pf(10 + c) - tf(10 + c)
            sq.append(d * d)
        while len(sq) > 1:
            nxt = [sq[i] + sq[i + 1] for i in range(0, len(sq) - 1, 2)]
            if len(sq) % 2:
                nxt.append(sq[-1])
            sq = nxt
        cls_term = obj * sq[0]

        return acc + partial + cls_term

    total = lax.fori_loop(0, n_sub, sub_body,
                          jnp.zeros((SUB, LANE), f32), unroll=True)
    acc_ref[...] += total

    @pl.when(g == pl.num_programs(1) - 1)
    def _finish():
        row = jnp.sum(acc_ref[...], axis=1, keepdims=True)      # (SUB, 1)
        out_ref[...] = jnp.sum(row, axis=0, keepdims=True) * inv_bs


def yolo_loss(pred_nchw, target, *, lambda_coord=5.0, lambda_noobj=0.5,
              grid=7, block_chunks=64, num_partitions=2, approx_iou=False):
    """pred_nchw: (bs, 30, S, S) conv-head output (NCHW, like the PyTorch model).
    target: (bs, S, S, 30) / (bs*S*S, 30) channel-last, or (30, bs*S*S)
    field-major (preferred upstream layout — skips the transpose pass)."""
    bs = pred_nchw.shape[0]
    ss = grid * grid
    n = bs * ss

    # Field-major, lane-dense (30, N).  NCHW is already field-major per batch,
    # so pred needs only one cheap relayout (batch folded into the lane dim).
    pred_fm = jnp.transpose(pred_nchw.reshape(bs, 30, ss), (1, 0, 2)).reshape(30, n)
    if target.ndim == 2 and target.shape == (30, n):
        tgt_fm = target
    else:
        # TODO(synk): deliver targets field-major (30, bs*S*S) from the data
        # pipeline so this extra full HBM transpose pass disappears.
        tgt_fm = jnp.transpose(jnp.reshape(target, (n, 30)), (1, 0))

    nb = pl.cdiv(n, LANE)                    # number of 128-wide column chunks
    nb8 = _round_up(nb, SUB)
    blk_cap = max(SUB, min(block_chunks, nb8))
    nblocks = pl.cdiv(nb8, blk_cap)
    # 2-way "parallel" split of the blocks (2 TensorCores on v7x); only when
    # there is enough work, neutral on single-core chips.
    ncore = num_partitions if nblocks >= 2 * num_partitions else 1
    nblocks = _round_up(nblocks, ncore)
    blk = _round_up(pl.cdiv(nb8, nblocks), SUB)     # shrink block => less pad
    nb_pad = nblocks * blk
    n_pad = nb_pad * LANE
    assert n_pad < (1 << 20), "in-kernel offset math assumes < 2**20 grid cells"
    if n_pad != n:
        pad = ((0, 0), (0, n_pad - n))   # zero pad => exactly zero contribution
        pred_fm = jnp.pad(pred_fm, pad)
        tgt_fm = jnp.pad(tgt_fm, pad)
    pred_3d = pred_fm.reshape(30, nb_pad, LANE)
    tgt_3d = tgt_fm.reshape(30, nb_pad, LANE)
    tiles_per_core = nblocks // ncore

    kernel = functools.partial(
        _yolo_loss_kernel, grid_sz=grid, blk=blk,
        lambda_coord=float(lambda_coord), lambda_noobj=float(lambda_noobj),
        inv_bs=1.0 / float(bs), approx_iou=approx_iou)

    partials = pl.pallas_call(
        kernel,
        out_shape=jax.ShapeDtypeStruct((ncore, 1), jnp.float32),
        grid=(ncore, tiles_per_core),
        in_specs=[
            pl.BlockSpec((30, blk, LANE),
                         lambda c, g: (0, c * tiles_per_core + g, 0)),
            pl.BlockSpec((30, blk, LANE),
                         lambda c, g: (0, c * tiles_per_core + g, 0)),
        ],
        out_specs=pl.BlockSpec((1, 1), lambda c, g: (c, 0)),
        scratch_shapes=[pltpu.VMEM((SUB, LANE), jnp.float32)],
        compiler_params=pltpu.CompilerParams(
            dimension_semantics=("parallel", "arbitrary")),
    )(pred_3d, tgt_3d)
    return jnp.sum(partials)


def yolo_loss_ref(pred_nchw, target, *, lambda_coord, lambda_noobj, grid=7):
    """Pure-jnp mirror of the PyTorch reference (for correctness checking)."""
    bs = pred_nchw.shape[0]
    inp = jnp.transpose(pred_nchw, (0, 2, 3, 1)).reshape(-1, 30).astype(jnp.float32)
    tgt = jnp.reshape(target, (-1, 30)).astype(jnp.float32)
    S = grid
    each = 448.0 / S
    n = inp.shape[0]
    idx = jnp.arange(n)
    cell = idx % (S * S)
    h_off = (cell % S).astype(jnp.float32) * each
    v_off = (cell // S).astype(jnp.float32) * each

    def corners(x, y, w, h):
        return (jnp.clip(x - w / 2, 0.0, 448.0), jnp.clip(y - h / 2, 0.0, 448.0),
                jnp.clip(x + w / 2, 0.0, 448.0), jnp.clip(y + h / 2, 0.0, 448.0))

    def iou(a, b):
        left = jnp.maximum(a[0], b[0]); right = jnp.minimum(a[2], b[2])
        top = jnp.maximum(a[1], b[1]); bottom = jnp.minimum(a[3], b[3])
        w = jnp.maximum(right - left, 1e-6); h = jnp.maximum(bottom - top, 1e-6)
        inter = w * h
        union = (a[2] - a[0]) * (a[3] - a[1]) + (b[2] - b[0]) * (b[3] - b[1])
        return inter / (union - inter)

    def boxes(t, base):
        return corners(t[:, base + 0] * each + h_off, t[:, base + 1] * each + v_off,
                       t[:, base + 2] * 448.0, t[:, base + 3] * 448.0)

    iou1 = iou(boxes(inp, 0), boxes(tgt, 0))
    iou2 = iou(boxes(inp, 5), boxes(tgt, 5))
    m = iou1 < iou2
    iou_sel = jnp.where(m, iou2, iou1)
    has_obj = tgt[:, 4] > 0
    obj = has_obj.astype(jnp.float32)
    sel = jnp.where(m[:, None], inp[:, 5:10], inp[:, 0:5])
    noobj_err = jnp.sum((1.0 - obj) * (inp[:, 4] ** 2 + inp[:, 9] ** 2))
    coord_err = jnp.sum(obj * ((sel[:, 0] - tgt[:, 0]) ** 2 +
                               (sel[:, 1] - tgt[:, 1]) ** 2))
    sf = lambda v: jnp.sqrt(jnp.where(has_obj, v, 1.0))
    size_err = jnp.sum(obj * ((sf(sel[:, 2]) - sf(tgt[:, 2])) ** 2 +
                              (sf(sel[:, 3]) - sf(tgt[:, 3])) ** 2))
    conf_err = jnp.sum(obj * (sel[:, 4] - iou_sel) ** 2)
    cls_err = jnp.sum(obj * jnp.sum((inp[:, 10:] - tgt[:, 10:]) ** 2, axis=-1))
    loss = (lambda_coord * coord_err + lambda_coord * size_err + conf_err +
            lambda_noobj * noobj_err + cls_err)
    return loss / bs


if __name__ == "__main__":
    key = jax.random.PRNGKey(0)

    def make_inputs(k, bs, grid=7):
        k1, k2, k3 = jax.random.split(k, 3)
        pred = jax.random.uniform(k1, (bs, 30, grid, grid), jnp.float32,
                                  minval=0.05, maxval=0.95)
        target = jax.random.uniform(k2, (bs, grid, grid, 30), jnp.float32,
                                    minval=0.05, maxval=0.95)
        # zero confidence for ~40% of cells so hasObj exercises both branches
        obj_mask = (jax.random.uniform(k3, (bs, grid, grid)) > 0.4).astype(jnp.float32)
        return pred, target.at[..., 4].set(target[..., 4] * obj_mask)

    k_small, k_big = jax.random.split(key)

    # 1) Small, spec-consistent shapes (batch=2, grid=7): single (8,128) tile.
    pred, target = make_inputs(k_small, bs=2)
    loss = yolo_loss(pred, target, lambda_coord=5.0, lambda_noobj=0.5, grid=7)
    ref = yolo_loss_ref(pred, target, lambda_coord=5.0, lambda_noobj=0.5, grid=7)
    jax.block_until_ready(loss)
    assert jnp.isfinite(loss), "loss is not finite"
    assert jnp.allclose(loss, ref, rtol=2e-3, atol=1e-2), (loss, ref)

    # 2) Larger run with a small block size to exercise the multi-block
    #    accumulator, the unrolled inner loop and the 2-way parallel axis.
    pred, target = make_inputs(k_big, bs=192)
    loss = yolo_loss(pred, target, lambda_coord=5.0, lambda_noobj=0.5, grid=7,
                     block_chunks=16, num_partitions=2)
    ref = yolo_loss_ref(pred, target, lambda_coord=5.0, lambda_noobj=0.5, grid=7)
    jax.block_until_ready(loss)
    assert jnp.isfinite(loss), "loss is not finite"
    assert jnp.allclose(loss, ref, rtol=2e-3, atol=1e-2), (loss, ref)

    print("KERNEL_OK")
</pallas_src>

<mosaic_0001>
module attributes {stable_mosaic.version = 11 : i64} {
  func.func @_yolo_loss_kernel(%arg0: i32, %arg1: i32, %arg2: memref<30x8x128xf32, #tpu.memory_space<vmem>>, %arg3: memref<30x8x128xf32, #tpu.memory_space<vmem>>, %arg4: memref<1x1xf32, #tpu.memory_space<vmem>>, %arg5: memref<8x128xf32, #tpu.memory_space<vmem>>) attributes {dimension_semantics = [#tpu.dimension_semantics<parallel>, #tpu.dimension_semantics<arbitrary>], iteration_bounds = array<i64: 1, 1>, scalar_prefetch = 0 : i64, scratch_operands = 1 : i64, tpu.core_type = #tpu.core_type<tc>, window_params = [{transform_indices = @transform_0, window_bounds = array<i64: 30, 8, 128>}, {transform_indices = @transform_1, window_bounds = array<i64: 30, 8, 128>}, {transform_indices = @transform_2, window_bounds = array<i64: 1, 1>}]} {
    %c0_i32 = arith.constant 0 : i32
    %0 = arith.cmpi eq, %arg1, %c0_i32 : i32
    %1 = arith.extui %0 : i1 to i32
    %c0_i32_0 = arith.constant 0 : i32
    %2 = arith.cmpi ne, %1, %c0_i32_0 : i32
    scf.if %2 {
      %cst_182 = arith.constant 0.000000e+00 : f32
      %530 = vector.broadcast %cst_182 : f32 to vector<8x128xf32>
      %c0_183 = arith.constant 0 : index
      %c0_184 = arith.constant 0 : index
      %531 = vector.load %arg5[%c0_183, %c0_184] : memref<8x128xf32, #tpu.memory_space<vmem>>, vector<8x128xf32>
      tpu.vector_store %arg5[%c0_183, %c0_184], %530 {strides = array<i32>} : memref<8x128xf32, #tpu.memory_space<vmem>>, vector<8x128xf32>,
    } else {
    }
    %3 = tpu.iota {dimensions = array<i32: 0>} : vector<8x128xi32>
    %c128_i32 = arith.constant 128 : i32
    %4 = vector.broadcast %c128_i32 : i32 to vector<8x128xi32>
    %5 = arith.muli %3, %4 : vector<8x128xi32>
    %6 = tpu.iota {dimensions = array<i32: 1>} : vector<8x128xi32>
    %7 = arith.addi %5, %6 : vector<8x128xi32>
    %8 = arith.sitofp %7 : vector<8x128xi32> to vector<8x128xf32>
    %c1_i32 = arith.constant 1 : i32
    %9 = arith.muli %arg0, %c1_i32 : i32
    %10 = arith.addi %9, %arg1 : i32
    %c1024_i32 = arith.constant 1024 : i32
    %11 = arith.muli %10, %c1024_i32 : i32
    %cst = arith.constant 0.000000e+00 : f32
    %12 = vector.broadcast %cst : f32 to vector<8x128xf32>
    %c0_i32_1 = arith.constant 0 : i32
    %c8_i32 = arith.constant 8 : i32
    %13 = arith.muli %c0_i32_1, %c8_i32 : i32
    %14 = tpu.assume_multiple %13, 8 : i32
    %c0 = arith.constant 0 : index
    %15 = arith.index_cast %14 : i32 to index
    %c0_2 = arith.constant 0 : index
    %16 = vector.load %arg2[%c0, %15, %c0_2] : memref<30x8x128xf32, #tpu.memory_space<vmem>>, vector<1x8x128xf32>
    %17 = vector.shape_cast %16 : vector<1x8x128xf32> to vector<8x128xf32>
    %c1 = arith.constant 1 : index
    %18 = arith.index_cast %14 : i32 to index
    %c0_3 = arith.constant 0 : index
    %19 = vector.load %arg2[%c1, %18, %c0_3] : memref<30x8x128xf32, #tpu.memory_space<vmem>>, vector<1x8x128xf32>
    %20 = vector.shape_cast %19 : vector<1x8x128xf32> to vector<8x128xf32>
    %c2 = arith.constant 2 : index
    %21 = arith.index_cast %14 : i32 to index
    %c0_4 = arith.constant 0 : index
    %22 = vector.load %arg2[%c2, %21, %c0_4] : memref<30x8x128xf32, #tpu.memory_space<vmem>>, vector<1x8x128xf32>
    %23 = vector.shape_cast %22 : vector<1x8x128xf32> to vector<8x128xf32>
    %c3 = arith.constant 3 : index
    %24 = arith.index_cast %14 : i32 to index
    %c0_5 = arith.constant 0 : index
    %25 = vector.load %arg2[%c3, %24, %c0_5] : memref<30x8x128xf32, #tpu.memory_space<vmem>>, vector<1x8x128xf32>
    %26 = vector.shape_cast %25 : vector<1x8x128xf32> to vector<8x128xf32>
    %c4 = arith.constant 4 : index
    %27 = arith.index_cast %14 : i32 to index
    %c0_6 = arith.constant 0 : index
    %28 = vector.load %arg2[%c4, %27, %c0_6] : memref<30x8x128xf32, #tpu.memory_space<vmem>>, vector<1x8x128xf32>
    %29 = vector.shape_cast %28 : vector<1x8x128xf32> to vector<8x128xf32>
    %c5 = arith.constant 5 : index
    %30 = arith.index_cast %14 : i32 to index
    %c0_7 = arith.constant 0 : index
    %31 = vector.load %arg2[%c5, %30, %c0_7] : memref<30x8x128xf32, #tpu.memory_space<vmem>>, vector<1x8x128xf32>
    %32 = vector.shape_cast %31 : vector<1x8x128xf32> to vector<8x128xf32>
    %c6 = arith.constant 6 : index
    %33 = arith.index_cast %14 : i32 to index
    %c0_8 = arith.constant 0 : index
    %34 = vector.load %arg2[%c6, %33, %c0_8] : memref<30x8x128xf32, #tpu.memory_space<vmem>>, vector<1x8x128xf32>
    %35 = vector.shape_cast %34 : vector<1x8x128xf32> to vector<8x128xf32>
    %c7 = arith.constant 7 : index
    %36 = arith.index_cast %14 : i32 to index
    %c0_9 = arith.constant 0 : index
    %37 = vector.load %arg2[%c7, %36, %c0_9] : memref<30x8x128xf32, #tpu.memory_space<vmem>>, vector<1x8x128xf32>
    %38 = vector.shape_cast %37 : vector<1x8x128xf32> to vector<8x128xf32>
    %c8 = arith.constant 8 : index
    %39 = arith.index_cast %14 : i32 to index
    %c0_10 = arith.constant 0 : index
    %40 = vector.load %arg2[%c8, %39, %c0_10] : memref<30x8x128xf32, #tpu.memory_space<vmem>>, vector<1x8x128xf32>
    %41 = vector.shape_cast %40 : vector<1x8x128xf32> to vector<8x128xf32>
    %c9 = arith.constant 9 : index
    %42 = arith.index_cast %14 : i32 to index
    %c0_11 = arith.constant 0 : index
    %43 = vector.load %arg2[%c9, %42, %c0_11] : memref<30x8x128xf32, #tpu.memory_space<vmem>>, vector<1x8x128xf32>
    %44 = vector.shape_cast %43 : vector<1x8x128xf32> to vector<8x128xf32>
    %c0_12 = arith.constant 0 : index
    %45 = arith.index_cast %14 : i32 to index
    %c0_13 = arith.constant 0 : index
    %46 = vector.load %arg3[%c0_12, %45, %c0_13] : memref<30x8x128xf32, #tpu.memory_space<vmem>>, vector<1x8x128xf32>
    %47 = vector.shape_cast %46 : vector<1x8x128xf32> to vector<8x128xf32>
    %c1_14 = arith.constant 1 : index
    %48 = arith.index_cast %14 : i32 to index
    %c0_15 = arith.constant 0 : index
    %49 = vector.load %arg3[%c1_14, %48, %c0_15] : memref<30x8x128xf32, #tpu.memory_space<vmem>>, vector<1x8x128xf32>
    %50 = vector.shape_cast %49 : vector<1x8x128xf32> to vector<8x128xf32>
    %c2_16 = arith.constant 2 : index
    %51 = arith.index_cast %14 : i32 to index
    %c0_17 = arith.constant 0 : index
    %52 = vector.load %arg3[%c2_16, %51, %c0_17] : memref<30x8x128xf32, #tpu.memory_space<vmem>>, vector<1x8x128xf32>
    %53 = vector.shape_cast %52 : vector<1x8x128xf32> to vector<8x128xf32>
    %c3_18 = arith.constant 3 : index
    %54 = arith.index_cast %14 : i32 to index
    %c0_19 = arith.constant 0 : index
    %55 = vector.load %arg3[%c3_18, %54, %c0_19] : memref<30x8x128xf32, #tpu.memory_space<vmem>>, vector<1x8x128xf32>
    %56 = vector.shape_cast %55 : vector<1x8x128xf32> to vector<8x128xf32>
    %c4_20 = arith.constant 4 : index
    %57 = arith.index_cast %14 : i32 to index
    %c0_21 = arith.constant 0 : index
    %58 = vector.load %arg3[%c4_20, %57, %c0_21] : memref<30x8x128xf32, #tpu.memory_space<vmem>>, vector<1x8x128xf32>
    %59 = vector.shape_cast %58 : vector<1x8x128xf32> to vector<8x128xf32>
    %c5_22 = arith.constant 5 : index
    %60 = arith.index_cast %14 : i32 to index
    %c0_23 = arith.constant 0 : index
    %61 = vector.load %arg3[%c5_22, %60, %c0_23] : memref<30x8x128xf32, #tpu.memory_space<vmem>>, vector<1x8x128xf32>
    %62 = vector.shape_cast %61 : vector<1x8x128xf32> to vector<8x128xf32>
    %c6_24 = arith.constant 6 : index
    %63 = arith.index_cast %14 : i32 to index
    %c0_25 = arith.constant 0 : index
    %64 = vector.load %arg3[%c6_24, %63, %c0_25] : memref<30x8x128xf32, #tpu.memory_space<vmem>>, vector<1x8x128xf32>
    %65 = vector.shape_cast %64 : vector<1x8x128xf32> to vector<8x128xf32>
    %c7_26 = arith.constant 7 : index
    %66 = arith.index_cast %14 : i32 to index
    %c0_27 = arith.constant 0 : index
    %67 = vector.load %arg3[%c7_26, %66, %c0_27] : memref<30x8x128xf32, #tpu.memory_space<vmem>>, vector<1x8x128xf32>
    %68 = vector.shape_cast %67 : vector<1x8x128xf32> to vector<8x128xf32>
    %c8_28 = arith.constant 8 : index
    %69 = arith.index_cast %14 : i32 to index
    %c0_29 = arith.constant 0 : index
    %70 = vector.load %arg3[%c8_28, %69, %c0_29] : memref<30x8x128xf32, #tpu.memory_space<vmem>>, vector<1x8x128xf32>
    %71 = vector.shape_cast %70 : vector<1x8x128xf32> to vector<8x128xf32>
    %c1024_i32_30 = arith.constant 1024 : i32
    %72 = arith.muli %c0_i32_1, %c1024_i32_30 : i32
    %73 = arith.addi %11, %72 : i32
    %74 = arith.sitofp %73 : i32 to f32
    %75 = vector.broadcast %74 : f32 to vector<8x128xf32>
    %76 = arith.addf %75, %8 : vector<8x128xf32>
    %cst_31 = arith.constant 5.000000e-01 : f32
    %77 = vector.broadcast %cst_31 : f32 to vector<8x128xf32>
    %78 = arith.addf %76, %77 : vector<8x128xf32>
    %cst_32 = arith.constant 0.0204081628 : f32
    %79 = vector.broadcast %cst_32 : f32 to vector<8x128xf32>
    %80 = arith.mulf %78, %79 : vector<8x128xf32>
    %81 = math.floor %80 : vector<8x128xf32>
    %cst_33 = arith.constant 4.900000e+01 : f32
    %82 = vector.broadcast %cst_33 : f32 to vector<8x128xf32>
    %83 = arith.mulf %81, %82 : vector<8x128xf32>
    %84 = arith.subf %76, %83 : vector<8x128xf32>
    %cst_34 = arith.constant 5.000000e-01 : f32
    %85 = vector.broadcast %cst_34 : f32 to vector<8x128xf32>
    %86 = arith.addf %84, %85 : vector<8x128xf32>
    %cst_35 = arith.constant 0.142857149 : f32
    %87 = vector.broadcast %cst_35 : f32 to vector<8x128xf32>
    %88 = arith.mulf %86, %87 : vector<8x128xf32>
    %89 = math.floor %88 : vector<8x128xf32>
    %cst_36 = arith.constant 7.000000e+00 : f32
    %90 = vector.broadcast %cst_36 : f32 to vector<8x128xf32>
    %91 = arith.mulf %89, %90 : vector<8x128xf32>
    %92 = arith.subf %84, %91 : vector<8x128xf32>
    %cst_37 = arith.constant 6.400000e+01 : f32
    %93 = vector.broadcast %cst_37 : f32 to vector<8x128xf32>
    %94 = arith.mulf %92, %93 : vector<8x128xf32>
    %cst_38 = arith.constant 6.400000e+01 : f32
    %95 = vector.broadcast %cst_38 : f32 to vector<8x128xf32>
    %96 = arith.mulf %89, %95 : vector<8x128xf32>
    %cst_39 = arith.constant 6.400000e+01 : f32
    %97 = vector.broadcast %cst_39 : f32 to vector<8x128xf32>
    %98 = arith.mulf %17, %97 : vector<8x128xf32>
    %99 = arith.addf %98, %94 : vector<8x128xf32>
    %cst_40 = arith.constant 6.400000e+01 : f32
    %100 = vector.broadcast %cst_40 : f32 to vector<8x128xf32>
    %101 = arith.mulf %20, %100 : vector<8x128xf32>
    %102 = arith.addf %101, %96 : vector<8x128xf32>
    %cst_41 = arith.constant 4.480000e+02 : f32
    %103 = vector.broadcast %cst_41 : f32 to vector<8x128xf32>
    %104 = arith.mulf %23, %103 : vector<8x128xf32>
    %cst_42 = arith.constant 4.480000e+02 : f32
    %105 = vector.broadcast %cst_42 : f32 to vector<8x128xf32>
    %106 = arith.mulf %26, %105 : vector<8x128xf32>
    %cst_43 = arith.constant 5.000000e-01 : f32
    %107 = vector.broadcast %cst_43 : f32 to vector<8x128xf32>
    %108 = arith.mulf %107, %104 : vector<8x128xf32>
    %109 = arith.subf %99, %108 : vector<8x128xf32>
    %cst_44 = arith.constant 0.000000e+00 : f32
    %cst_45 = arith.constant 4.480000e+02 : f32
    %110 = vector.broadcast %cst_44 : f32 to vector<8x128xf32>
    %111 = arith.maximumf %110, %109 : vector<8x128xf32>
    %112 = vector.broadcast %cst_45 : f32 to vector<8x128xf32>
    %113 = arith.minimumf %112, %111 : vector<8x128xf32>
    %cst_46 = arith.constant 5.000000e-01 : f32
    %114 = vector.broadcast %cst_46 : f32 to vector<8x128xf32>
    %115 = arith.mulf %114, %106 : vector<8x128xf32>
    %116 = arith.subf %102, %115 : vector<8x128xf32>
    %cst_47 = arith.constant 0.000000e+00 : f32
    %cst_48 = arith.constant 4.480000e+02 : f32
    %117 = vector.broadcast %cst_47 : f32 to vector<8x128xf32>
    %118 = arith.maximumf %117, %116 : vector<8x128xf32>
    %119 = vector.broadcast %cst_48 : f32 to vector<8x128xf32>
    %120 = arith.minimumf %119, %118 : vector<8x128xf32>
    %cst_49 = arith.constant 5.000000e-01 : f32
    %121 = vector.broadcast %cst_49 : f32 to vector<8x128xf32>
    %122 = arith.mulf %121, %104 : vector<8x128xf32>
    %123 = arith.addf %99, %122 : vector<8x128xf32>
    %cst_50 = arith.constant 0.000000e+00 : f32
    %cst_51 = arith.constant 4.480000e+02 : f32
    %124 = vector.broadcast %cst_50 : f32 to vector<8x128xf32>
    %125 = arith.maximumf %124, %123 : vector<8x128xf32>
    %126 = vector.broadcast %cst_51 : f32 to vector<8x128xf32>
    %127 = arith.minimumf %126, %125 : vector<8x128xf32>
    %cst_52 = arith.constant 5.000000e-01 : f32
    %128 = vector.broadcast %cst_52 : f32 to vector<8x128xf32>
    %129 = arith.mulf %128, %106 : vector<8x128xf32>
    %130 = arith.addf %102, %129 : vector<8x128xf32>
    %cst_53 = arith.constant 0.000000e+00 : f32
    %cst_54 = arith.constant 4.480000e+02 : f32
    %131 = vector.broadcast %cst_53 : f32 to vector<8x128xf32>
    %132 = arith.maximumf %131, %130 : vector<8x128xf32>
    %133 = vector.broadcast %cst_54 : f32 to vector<8x128xf32>
    %134 = arith.minimumf %133, %132 : vector<8x128xf32>
    %cst_55 = arith.constant 6.400000e+01 : f32
    %135 = vector.broadcast %cst_55 : f32 to vector<8x128xf32>
    %136 = arith.mulf %47, %135 : vector<8x128xf32>
    %137 = arith.addf %136, %94 : vector<8x128xf32>
    %cst_56 = arith.constant 6.400000e+01 : f32
    %138 = vector.broadcast %cst_56 : f32 to vector<8x128xf32>
    %139 = arith.mulf %50, %138 : vector<8x128xf32>
    %140 = arith.addf %139, %96 : vector<8x128xf32>
    %cst_57 = arith.constant 4.480000e+02 : f32
    %141 = vector.broadcast %cst_57 : f32 to vector<8x128xf32>
    %142 = arith.mulf %53, %141 : vector<8x128xf32>
    %cst_58 = arith.constant 4.480000e+02 : f32
    %143 = vector.broadcast %cst_58 : f32 to vector<8x128xf32>
    %144 = arith.mulf %56, %143 : vector<8x128xf32>
    %cst_59 = arith.constant 5.000000e-01 : f32
    %145 = vector.broadcast %cst_59 : f32 to vector<8x128xf32>
    %146 = arith.mulf %145, %142 : vector<8x128xf32>
    %147 = arith.subf %137, %146 : vector<8x128xf32>
    %cst_60 = arith.constant 0.000000e+00 : f32
    %cst_61 = arith.constant 4.480000e+02 : f32
    %148 = vector.broadcast %cst_60 : f32 to vector<8x128xf32>
    %149 = arith.maximumf %148, %147 : vector<8x128xf32>
    %150 = vector.broadcast %cst_61 : f32 to vector<8x128xf32>
    %151 = arith.minimumf %150, %149 : vector<8x128xf32>
    %cst_62 = arith.constant 5.000000e-01 : f32
    %152 = vector.broadcast %cst_62 : f32 to vector<8x128xf32>
    %153 = arith.mulf %152, %144 : vector<8x128xf32>
    %154 = arith.subf %140, %153 : vector<8x128xf32>
    %cst_63 = arith.constant 0.000000e+00 : f32
    %cst_64 = arith.constant 4.480000e+02 : f32
    %155 = vector.broadcast %cst_63 : f32 to vector<8x128xf32>
    %156 = arith.maximumf %155, %154 : vector<8x128xf32>
    %157 = vector.broadcast %cst_64 : f32 to vector<8x128xf32>
    %158 = arith.minimumf %157, %156 : vector<8x128xf32>
    %cst_65 = arith.constant 5.000000e-01 : f32
    %159 = vector.broadcast %cst_65 : f32 to vector<8x128xf32>
    %160 = arith.mulf %159, %142 : vector<8x128xf32>
    %161 = arith.addf %137, %160 : vector<8x128xf32>
    %cst_66 = arith.constant 0.000000e+00 : f32
    %cst_67 = arith.constant 4.480000e+02 : f32
    %162 = vector.broadcast %cst_66 : f32 to vector<8x128xf32>
    %163 = arith.maximumf %162, %161 : vector<8x128xf32>
    %164 = vector.broadcast %cst_67 : f32 to vector<8x128xf32>
    %165 = arith.minimumf %164, %163 : vector<8x128xf32>
    %cst_68 = arith.constant 5.000000e-01 : f32
    %166 = vector.broadcast %cst_68 : f32 to vector<8x128xf32>
    %167 = arith.mulf %166, %144 : vector<8x128xf32>
    %168 = arith.addf %140, %167 : vector<8x128xf32>
    %cst_69 = arith.constant 0.000000e+00 : f32
    %cst_70 = arith.constant 4.480000e+02 : f32
    %169 = vector.broadcast %cst_69 : f32 to vector<8x128xf32>
    %170 = arith.maximumf %169, %168 : vector<8x128xf32>
    %171 = vector.broadcast %cst_70 : f32 to vector<8x128xf32>
    %172 = arith.minimumf %171, %170 : vector<8x128xf32>
    %173 = arith.maximumf %113, %151 : vector<8x128xf32>
    %174 = arith.minimumf %127, %165 : vector<8x128xf32>
    %175 = arith.maximumf %120, %158 : vector<8x128xf32>
    %176 = arith.minimumf %134, %172 : vector<8x128xf32>
    %177 = arith.subf %174, %173 : vector<8x128xf32>
    %cst_71 = arith.constant 9.99999997E-7 : f32
    %178 = vector.broadcast %cst_71 : f32 to vector<8x128xf32>
    %179 = arith.maximumf %177, %178 : vector<8x128xf32>
    %180 = arith.subf %176, %175 : vector<8x128xf32>
    %cst_72 = arith.constant 9.99999997E-7 : f32
    %181 = vector.broadcast %cst_72 : f32 to vector<8x128xf32>
    %182 = arith.maximumf %180, %181 : vector<8x128xf32>
    %183 = arith.mulf %179, %182 : vector<8x128xf32>
    %184 = arith.subf %127, %113 : vector<8x128xf32>
    %185 = arith.subf %134, %120 : vector<8x128xf32>
    %186 = arith.mulf %184, %185 : vector<8x128xf32>
    %187 = arith.subf %165, %151 : vector<8x128xf32>
    %188 = arith.subf %172, %158 : vector<8x128xf32>
    %189 = arith.mulf %187, %188 : vector<8x128xf32>
    %190 = arith.addf %186, %189 : vector<8x128xf32>
    %191 = arith.subf %190, %183 : vector<8x128xf32>
    %192 = tpu.reciprocal %191 : vector<8x128xf32> -> vector<8x128xf32>
    %193 = arith.mulf %183, %192 : vector<8x128xf32>
    %cst_73 = arith.constant 6.400000e+01 : f32
    %194 = vector.broadcast %cst_73 : f32 to vector<8x128xf32>
    %195 = arith.mulf %32, %194 : vector<8x128xf32>
    %196 = arith.addf %195, %94 : vector<8x128xf32>
    %cst_74 = arith.constant 6.400000e+01 : f32
    %197 = vector.broadcast %cst_74 : f32 to vector<8x128xf32>
    %198 = arith.mulf %35, %197 : vector<8x128xf32>
    %199 = arith.addf %198, %96 : vector<8x128xf32>
    %cst_75 = arith.constant 4.480000e+02 : f32
    %200 = vector.broadcast %cst_75 : f32 to vector<8x128xf32>
    %201 = arith.mulf %38, %200 : vector<8x128xf32>
    %cst_76 = arith.constant 4.480000e+02 : f32
    %202 = vector.broadcast %cst_76 : f32 to vector<8x128xf32>
    %203 = arith.mulf %41, %202 : vector<8x128xf32>
    %cst_77 = arith.constant 5.000000e-01 : f32
    %204 = vector.broadcast %cst_77 : f32 to vector<8x128xf32>
    %205 = arith.mulf %204, %201 : vector<8x128xf32>
    %206 = arith.subf %196, %205 : vector<8x128xf32>
    %cst_78 = arith.constant 0.000000e+00 : f32
    %cst_79 = arith.constant 4.480000e+02 : f32
    %207 = vector.broadcast %cst_78 : f32 to vector<8x128xf32>
    %208 = arith.maximumf %207, %206 : vector<8x128xf32>
    %209 = vector.broadcast %cst_79 : f32 to vector<8x128xf32>
    %210 = arith.minimumf %209, %208 : vector<8x128xf32>
    %cst_80 = arith.constant 5.000000e-01 : f32
    %211 = vector.broadcast %cst_80 : f32 to vector<8x128xf32>
    %212 = arith.mulf %211, %203 : vector<8x128xf32>
    %213 = arith.subf %199, %212 : vector<8x128xf32>
    %cst_81 = arith.constant 0.000000e+00 : f32
    %cst_82 = arith.constant 4.480000e+02 : f32
    %214 = vector.broadcast %cst_81 : f32 to vector<8x128xf32>
    %215 = arith.maximumf %214, %213 : vector<8x128xf32>
    %216 = vector.broadcast %cst_82 : f32 to vector<8x128xf32>
    %217 = arith.minimumf %216, %215 : vector<8x128xf32>
    %cst_83 = arith.constant 5.000000e-01 : f32
    %218 = vector.broadcast %cst_83 : f32 to vector<8x128xf32>
    %219 = arith.mulf %218, %201 : vector<8x128xf32>
    %220 = arith.addf %196, %219 : vector<8x128xf32>
    %cst_84 = arith.constant 0.000000e+00 : f32
    %cst_85 = arith.constant 4.480000e+02 : f32
    %221 = vector.broadcast %cst_84 : f32 to vector<8x128xf32>
    %222 = arith.maximumf %221, %220 : vector<8x128xf32>
    %223 = vector.broadcast %cst_85 : f32 to vector<8x128xf32>
    %224 = arith.minimumf %223, %222 : vector<8x128xf32>
    %cst_86 = arith.constant 5.000000e-01 : f32
    %225 = vector.broadcast %cst_86 : f32 to vector<8x128xf32>
    %226 = arith.mulf %225, %203 : vector<8x128xf32>
    %227 = arith.addf %199, %226 : vector<8x128xf32>
    %cst_87 = arith.constant 0.000000e+00 : f32
    %cst_88 = arith.constant 4.480000e+02 : f32
    %228 = vector.broadcast %cst_87 : f32 to vector<8x128xf32>
    %229 = arith.maximumf %228, %227 : vector<8x128xf32>
    %230 = vector.broadcast %cst_88 : f32 to vector<8x128xf32>
    %231 = arith.minimumf %230, %229 : vector<8x128xf32>
    %cst_89 = arith.constant 6.400000e+01 : f32
    %232 = vector.broadcast %cst_89 : f32 to vector<8x128xf32>
    %233 = arith.mulf %62, %232 : vector<8x128xf32>
    %234 = arith.addf %233, %94 : vector<8x128xf32>
    %cst_90 = arith.constant 6.400000e+01 : f32
    %235 = vector.broadcast %cst_90 : f32 to vector<8x128xf32>
    %236 = arith.mulf %65, %235 : vector<8x128xf32>
    %237 = arith.addf %236, %96 : vector<8x128xf32>
    %cst_91 = arith.constant 4.480000e+02 : f32
    %238 = vector.broadcast %cst_91 : f32 to vector<8x128xf32>
    %239 = arith.mulf %68, %238 : vector<8x128xf32>
    %cst_92 = arith.constant 4.480000e+02 : f32
    %240 = vector.broadcast %cst_92 : f32 to vector<8x128xf32>
    %241 = arith.mulf %71, %240 : vector<8x128xf32>
    %cst_93 = arith.constant 5.000000e-01 : f32
    %242 = vector.broadcast %cst_93 : f32 to vector<8x128xf32>
    %243 = arith.mulf %242, %239 : vector<8x128xf32>
    %244 = arith.subf %234, %243 : vector<8x128xf32>
    %cst_94 = arith.constant 0.000000e+00 : f32
    %cst_95 = arith.constant 4.480000e+02 : f32
    %245 = vector.broadcast %cst_94 : f32 to vector<8x128xf32>
    %246 = arith.maximumf %245, %244 : vector<8x128xf32>
    %247 = vector.broadcast %cst_95 : f32 to vector<8x128xf32>
    %248 = arith.minimumf %247, %246 : vector<8x128xf32>
    %cst_96 = arith.constant 5.000000e-01 : f32
    %249 = vector.broadcast %cst_96 : f32 to vector<8x128xf32>
    %250 = arith.mulf %249, %241 : vector<8x128xf32>
    %251 = arith.subf %237, %250 : vector<8x128xf32>
    %cst_97 = arith.constant 0.000000e+00 : f32
    %cst_98 = arith.constant 4.480000e+02 : f32
    %252 = vector.broadcast %cst_97 : f32 to vector<8x128xf32>
    %253 = arith.maximumf %252, %251 : vector<8x128xf32>
    %254 = vector.broadcast %cst_98 : f32 to vector<8x128xf32>
    %255 = arith.minimumf %254, %253 : vector<8x128xf32>
    %cst_99 = arith.constant 5.000000e-01 : f32
    %256 = vector.broadcast %cst_99 : f32 to vector<8x128xf32>
    %257 = arith.mulf %256, %239 : vector<8x128xf32>
    %258 = arith.addf %234, %257 : vector<8x128xf32>
    %cst_100 = arith.constant 0.000000e+00 : f32
    %cst_101 = arith.constant 4.480000e+02 : f32
    %259 = vector.broadcast %cst_100 : f32 to vector<8x128xf32>
    %260 = arith.maximumf %259, %258 : vector<8x128xf32>
    %261 = vector.broadcast %cst_101 : f32 to vector<8x128xf32>
    %262 = arith.minimumf %261, %260 : vector<8x128xf32>
    %cst_102 = arith.constant 5.000000e-01 : f32
    %263 = vector.broadcast %cst_102 : f32 to vector<8x128xf32>
    %264 = arith.mulf %263, %241 : vector<8x128xf32>
    %265 = arith.addf %237, %264 : vector<8x128xf32>
    %cst_103 = arith.constant 0.000000e+00 : f32
    %cst_104 = arith.constant 4.480000e+02 : f32
    %266 = vector.broadcast %cst_103 : f32 to vector<8x128xf32>
    %267 = arith.maximumf %266, %265 : vector<8x128xf32>
    %268 = vector.broadcast %cst_104 : f32 to vector<8x128xf32>
    %269 = arith.minimumf %268, %267 : vector<8x128xf32>
    %270 = arith.maximumf %210, %248 : vector<8x128xf32>
    %271 = arith.minimumf %224, %262 : vector<8x128xf32>
    %272 = arith.maximumf %217, %255 : vector<8x128xf32>
    %273 = arith.minimumf %231, %269 : vector<8x128xf32>
    %274 = arith.subf %271, %270 : vector<8x128xf32>
    %cst_105 = arith.constant 9.99999997E-7 : f32
    %275 = vector.broadcast %cst_105 : f32 to vector<8x128xf32>
    %276 = arith.maximumf %274, %275 : vector<8x128xf32>
    %277 = arith.subf %273, %272 : vector<8x128xf32>
    %cst_106 = arith.constant 9.99999997E-7 : f32
    %278 = vector.broadcast %cst_106 : f32 to vector<8x128xf32>
    %279 = arith.maximumf %277, %278 : vector<8x128xf32>
    %280 = arith.mulf %276, %279 : vector<8x128xf32>
    %281 = arith.subf %224, %210 : vector<8x128xf32>
    %282 = arith.subf %231, %217 : vector<8x128xf32>
    %283 = arith.mulf %281, %282 : vector<8x128xf32>
    %284 = arith.subf %262, %248 : vector<8x128xf32>
    %285 = arith.subf %269, %255 : vector<8x128xf32>
    %286 = arith.mulf %284, %285 : vector<8x128xf32>
    %287 = arith.addf %283, %286 : vector<8x128xf32>
    %288 = arith.subf %287, %280 : vector<8x128xf32>
    %289 = tpu.reciprocal %288 : vector<8x128xf32> -> vector<8x128xf32>
    %290 = arith.mulf %280, %289 : vector<8x128xf32>
    %291 = arith.cmpf olt, %193, %290 : vector<8x128xf32>
    %292 = arith.select %291, %290, %193 : vector<8x128xi1>, vector<8x128xf32>
    %cst_107 = arith.constant 0.000000e+00 : f32
    %293 = vector.broadcast %cst_107 : f32 to vector<8x128xf32>
    %294 = arith.cmpf ogt, %59, %293 : vector<8x128xf32>
    %295 = arith.extui %294 : vector<8x128xi1> to vector<8x128xi32>
    %296 = arith.sitofp %295 : vector<8x128xi32> to vector<8x128xf32>
    %cst_108 = arith.constant 1.000000e+00 : f32
    %297 = vector.broadcast %cst_108 : f32 to vector<8x128xf32>
    %298 = arith.subf %297, %296 : vector<8x128xf32>
    %299 = arith.select %291, %32, %17 : vector<8x128xi1>, vector<8x128xf32>
    %300 = arith.select %291, %35, %20 : vector<8x128xi1>, vector<8x128xf32>
    %301 = arith.select %291, %38, %23 : vector<8x128xi1>, vector<8x128xf32>
    %302 = arith.select %291, %41, %26 : vector<8x128xi1>, vector<8x128xf32>
    %303 = arith.select %291, %44, %29 : vector<8x128xi1>, vector<8x128xf32>
    %304 = arith.mulf %29, %29 : vector<8x128xf32>
    %305 = arith.mulf %44, %44 : vector<8x128xf32>
    %306 = arith.addf %304, %305 : vector<8x128xf32>
    %307 = arith.mulf %298, %306 : vector<8x128xf32>
    %308 = arith.subf %299, %47 : vector<8x128xf32>
    %309 = arith.mulf %308, %308 : vector<8x128xf32>
    %310 = arith.subf %300, %50 : vector<8x128xf32>
    %311 = arith.mulf %310, %310 : vector<8x128xf32>
    %312 = arith.addf %309, %311 : vector<8x128xf32>
    %313 = arith.mulf %296, %312 : vector<8x128xf32>
    %cst_109 = arith.constant 1.000000e+00 : f32
    %314 = vector.broadcast %cst_109 : f32 to vector<8x128xf32>
    %315 = arith.select %294, %301, %314 : vector<8x128xi1>, vector<8x128xf32>
    %316 = math.sqrt %315 : vector<8x128xf32>
    %cst_110 = arith.constant 1.000000e+00 : f32
    %317 = vector.broadcast %cst_110 : f32 to vector<8x128xf32>
    %318 = arith.select %294, %53, %317 : vector<8x128xi1>, vector<8x128xf32>
    %319 = math.sqrt %318 : vector<8x128xf32>
    %320 = arith.subf %316, %319 : vector<8x128xf32>
    %321 = arith.mulf %320, %320 : vector<8x128xf32>
    %cst_111 = arith.constant 1.000000e+00 : f32
    %322 = vector.broadcast %cst_111 : f32 to vector<8x128xf32>
    %323 = arith.select %294, %302, %322 : vector<8x128xi1>, vector<8x128xf32>
    %324 = math.sqrt %323 : vector<8x128xf32>
    %cst_112 = arith.constant 1.000000e+00 : f32
    %325 = vector.broadcast %cst_112 : f32 to vector<8x128xf32>
    %326 = arith.select %294, %56, %325 : vector<8x128xi1>, vector<8x128xf32>
    %327 = math.sqrt %326 : vector<8x128xf32>
    %328 = arith.subf %324, %327 : vector<8x128xf32>
    %329 = arith.mulf %328, %328 : vector<8x128xf32>
    %330 = arith.addf %321, %329 : vector<8x128xf32>
    %331 = arith.mulf %296, %330 : vector<8x128xf32>
    %332 = arith.subf %303, %292 : vector<8x128xf32>
    %333 = arith.mulf %332, %332 : vector<8x128xf32>
    %334 = arith.mulf %296, %333 : vector<8x128xf32>
    %335 = arith.addf %313, %331 : vector<8x128xf32>
    %cst_113 = arith.constant 5.000000e+00 : f32
    %336 = vector.broadcast %cst_113 : f32 to vector<8x128xf32>
    %337 = arith.mulf %336, %335 : vector<8x128xf32>
    %338 = arith.addf %337, %334 : vector<8x128xf32>
    %cst_114 = arith.constant 5.000000e-01 : f32
    %339 = vector.broadcast %cst_114 : f32 to vector<8x128xf32>
    %340 = arith.mulf %339, %307 : vector<8x128xf32>
    %341 = arith.addf %338, %340 : vector<8x128xf32>
    %c10 = arith.constant 10 : index
    %342 = arith.index_cast %14 : i32 to index
    %c0_115 = arith.constant 0 : index
    %343 = vector.load %arg2[%c10, %342, %c0_115] : memref<30x8x128xf32, #tpu.memory_space<vmem>>, vector<1x8x128xf32>
    %344 = vector.shape_cast %343 : vector<1x8x128xf32> to vector<8x128xf32>
    %c10_116 = arith.constant 10 : index
    %345 = arith.index_cast %14 : i32 to index
    %c0_117 = arith.constant 0 : index
    %346 = vector.load %arg3[%c10_116, %345, %c0_117] : memref<30x8x128xf32, #tpu.memory_space<vmem>>, vector<1x8x128xf32>
    %347 = vector.shape_cast %346 : vector<1x8x128xf32> to vector<8x128xf32>
    %348 = arith.subf %344, %347 : vector<8x128xf32>
    %349 = arith.mulf %348, %348 : vector<8x128xf32>
    %c11 = arith.constant 11 : index
    %350 = arith.index_cast %14 : i32 to index
    %c0_118 = arith.constant 0 : index
    %351 = vector.load %arg2[%c11, %350, %c0_118] : memref<30x8x128xf32, #tpu.memory_space<vmem>>, vector<1x8x128xf32>
    %352 = vector.shape_cast %351 : vector<1x8x128xf32> to vector<8x128xf32>
    %c11_119 = arith.constant 11 : index
    %353 = arith.index_cast %14 : i32 to index
    %c0_120 = arith.constant 0 : index
    %354 = vector.load %arg3[%c11_119, %353, %c0_120] : memref<30x8x128xf32, #tpu.memory_space<vmem>>, vector<1x8x128xf32>
    %355 = vector.shape_cast %354 : vector<1x8x128xf32> to vector<8x128xf32>
    %356 = arith.subf %352, %355 : vector<8x128xf32>
    %357 = arith.mulf %356, %356 : vector<8x128xf32>
    %c12 = arith.constant 12 : index
    %358 = arith.index_cast %14 : i32 to index
    %c0_121 = arith.constant 0 : index
    %359 = vector.load %arg2[%c12, %358, %c0_121] : memref<30x8x128xf32, #tpu.memory_space<vmem>>, vector<1x8x128xf32>
    %360 = vector.shape_cast %359 : vector<1x8x128xf32> to vector<8x128xf32>
    %c12_122 = arith.constant 12 : index
    %361 = arith.index_cast %14 : i32 to index
    %c0_123 = arith.constant 0 : index
    %362 = vector.load %arg3[%c12_122, %361, %c0_123] : memref<30x8x128xf32, #tpu.memory_space<vmem>>, vector<1x8x128xf32>
    %363 = vector.shape_cast %362 : vector<1x8x128xf32> to vector<8x128xf32>
    %364 = arith.subf %360, %363 : vector<8x128xf32>
    %365 = arith.mulf %364, %364 : vector<8x128xf32>
    %c13 = arith.constant 13 : index
    %366 = arith.index_cast %14 : i32 to index
    %c0_124 = arith.constant 0 : index
    %367 = vector.load %arg2[%c13, %366, %c0_124] : memref<30x8x128xf32, #tpu.memory_space<vmem>>, vector<1x8x128xf32>
    %368 = vector.shape_cast %367 : vector<1x8x128xf32> to vector<8x128xf32>
    %c13_125 = arith.constant 13 : index
    %369 = arith.index_cast %14 : i32 to index
    %c0_126 = arith.constant 0 : index
    %370 = vector.load %arg3[%c13_125, %369, %c0_126] : memref<30x8x128xf32, #tpu.memory_space<vmem>>, vector<1x8x128xf32>
    %371 = vector.shape_cast %370 : vector<1x8x128xf32> to vector<8x128xf32>
    %372 = arith.subf %368, %371 : vector<8x128xf32>
    %373 = arith.mulf %372, %372 : vector<8x128xf32>
    %c14 = arith.constant 14 : index
    %374 = arith.index_cast %14 : i32 to index
    %c0_127 = arith.constant 0 : index
    %375 = vector.load %arg2[%c14, %374, %c0_127] : memref<30x8x128xf32, #tpu.memory_space<vmem>>, vector<1x8x128xf32>
    %376 = vector.shape_cast %375 : vector<1x8x128xf32> to vector<8x128xf32>
    %c14_128 = arith.constant 14 : index
    %377 = arith.index_cast %14 : i32 to index
    %c0_129 = arith.constant 0 : index
    %378 = vector.load %arg3[%c14_128, %377, %c0_129] : memref<30x8x128xf32, #tpu.memory_space<vmem>>, vector<1x8x128xf32>
    %379 = vector.shape_cast %378 : vector<1x8x128xf32> to vector<8x128xf32>
    %380 = arith.subf %376, %379 : vector<8x128xf32>
    %381 = arith.mulf %380, %380 : vector<8x128xf32>
    %c15 = arith.constant 15 : index
    %382 = arith.index_cast %14 : i32 to index
    %c0_130 = arith.constant 0 : index
    %383 = vector.load %arg2[%c15, %382, %c0_130] : memref<30x8x128xf32, #tpu.memory_space<vmem>>, vector<1x8x128xf32>
    %384 = vector.shape_cast %383 : vector<1x8x128xf32> to vector<8x128xf32>
    %c15_131 = arith.constant 15 : index
    %385 = arith.index_cast %14 : i32 to index
    %c0_132 = arith.constant 0 : index
    %386 = vector.load %arg3[%c15_131, %385, %c0_132] : memref<30x8x128xf32, #tpu.memory_space<vmem>>, vector<1x8x128xf32>
    %387 = vector.shape_cast %386 : vector<1x8x128xf32> to vector<8x128xf32>
    %388 = arith.subf %384, %387 : vector<8x128xf32>
    %389 = arith.mulf %388, %388 : vector<8x128xf32>
    %c16 = arith.constant 16 : index
    %390 = arith.index_cast %14 : i32 to index
    %c0_133 = arith.constant 0 : index
    %391 = vector.load %arg2[%c16, %390, %c0_133] : memref<30x8x128xf32, #tpu.memory_space<vmem>>, vector<1x8x128xf32>
    %392 = vector.shape_cast %391 : vector<1x8x128xf32> to vector<8x128xf32>
    %c16_134 = arith.constant 16 : index
    %393 = arith.index_cast %14 : i32 to index
    %c0_135 = arith.constant 0 : index
    %394 = vector.load %arg3[%c16_134, %393, %c0_135] : memref<30x8x128xf32, #tpu.memory_space<vmem>>, vector<1x8x128xf32>
    %395 = vector.shape_cast %394 : vector<1x8x128xf32> to vector<8x128xf32>
    %396 = arith.subf %392, %395 : vector<8x128xf32>
    %397 = arith.mulf %396, %396 : vector<8x128xf32>
    %c17 = arith.constant 17 : index
    %398 = arith.index_cast %14 : i32 to index
    %c0_136 = arith.constant 0 : index
    %399 = vector.load %arg2[%c17, %398, %c0_136] : memref<30x8x128xf32, #tpu.memory_space<vmem>>, vector<1x8x128xf32>
    %400 = vector.shape_cast %399 : vector<1x8x128xf32> to vector<8x128xf32>
    %c17_137 = arith.constant 17 : index
    %401 = arith.index_cast %14 : i32 to index
    %c0_138 = arith.constant 0 : index
    %402 = vector.load %arg3[%c17_137, %401, %c0_138] : memref<30x8x128xf32, #tpu.memory_space<vmem>>, vector<1x8x128xf32>
    %403 = vector.shape_cast %402 : vector<1x8x128xf32> to vector<8x128xf32>
    %404 = arith.subf %400, %403 : vector<8x128xf32>
    %405 = arith.mulf %404, %404 : vector<8x128xf32>
    %c18 = arith.constant 18 : index
    %406 = arith.index_cast %14 : i32 to index
    %c0_139 = arith.constant 0 : index
    %407 = vector.load %arg2[%c18, %406, %c0_139] : memref<30x8x128xf32, #tpu.memory_space<vmem>>, vector<1x8x128xf32>
    %408 = vector.shape_cast %407 : vector<1x8x128xf32> to vector<8x128xf32>
    %c18_140 = arith.constant 18 : index
    %409 = arith.index_cast %14 : i32 to index
    %c0_141 = arith.constant 0 : index
    %410 = vector.load %arg3[%c18_140, %409, %c0_141] : memref<30x8x128xf32, #tpu.memory_space<vmem>>, vector<1x8x128xf32>
    %411 = vector.shape_cast %410 : vector<1x8x128xf32> to vector<8x128xf32>
    %412 = arith.subf %408, %411 : vector<8x128xf32>
    %413 = arith.mulf %412, %412 : vector<8x128xf32>
    %c19 = arith.constant 19 : index
    %414 = arith.index_cast %14 : i32 to index
    %c0_142 = arith.constant 0 : index
    %415 = vector.load %arg2[%c19, %414, %c0_142] : memref<30x8x128xf32, #tpu.memory_space<vmem>>, vector<1x8x128xf32>
    %416 = vector.shape_cast %415 : vector<1x8x128xf32> to vector<8x128xf32>
    %c19_143 = arith.constant 19 : index
    %417 = arith.index_cast %14 : i32 to index
    %c0_144 = arith.constant 0 : index
    %418 = vector.load %arg3[%c19_143, %417, %c0_144] : memref<30x8x128xf32, #tpu.memory_space<vmem>>, vector<1x8x128xf32>
    %419 = vector.shape_cast %418 : vector<1x8x128xf32> to vector<8x128xf32>
    %420 = arith.subf %416, %419 : vector<8x128xf32>
    %421 = arith.mulf %420, %420 : vector<8x128xf32>
    %c20 = arith.constant 20 : index
    %422 = arith.index_cast %14 : i32 to index
    %c0_145 = arith.constant 0 : index
    %423 = vector.load %arg2[%c20, %422, %c0_145] : memref<30x8x128xf32, #tpu.memory_space<vmem>>, vector<1x8x128xf32>
    %424 = vector.shape_cast %423 : vector<1x8x128xf32> to vector<8x128xf32>
    %c20_146 = arith.constant 20 : index
    %425 = arith.index_cast %14 : i32 to index
    %c0_147 = arith.constant 0 : index
    %426 = vector.load %arg3[%c20_146, %425, %c0_147] : memref<30x8x128xf32, #tpu.memory_space<vmem>>, vector<1x8x128xf32>
    %427 = vector.shape_cast %426 : vector<1x8x128xf32> to vector<8x128xf32>
    %428 = arith.subf %424, %427 : vector<8x128xf32>
    %429 = arith.mulf %428, %428 : vector<8x128xf32>
    %c21 = arith.constant 21 : index
    %430 = arith.index_cast %14 : i32 to index
    %c0_148 = arith.constant 0 : index
    %431 = vector.load %arg2[%c21, %430, %c0_148] : memref<30x8x128xf32, #tpu.memory_space<vmem>>, vector<1x8x128xf32>
    %432 = vector.shape_cast %431 : vector<1x8x128xf32> to vector<8x128xf32>
    %c21_149 = arith.constant 21 : index
    %433 = arith.index_cast %14 : i32 to index
    %c0_150 = arith.constant 0 : index
    %434 = vector.load %arg3[%c21_149, %433, %c0_150] : memref<30x8x128xf32, #tpu.memory_space<vmem>>, vector<1x8x128xf32>
    %435 = vector.shape_cast %434 : vector<1x8x128xf32> to vector<8x128xf32>
    %436 = arith.subf %432, %435 : vector<8x128xf32>
    %437 = arith.mulf %436, %436 : vector<8x128xf32>
    %c22 = arith.constant 22 : index
    %438 = arith.index_cast %14 : i32 to index
    %c0_151 = arith.constant 0 : index
    %439 = vector.load %arg2[%c22, %438, %c0_151] : memref<30x8x128xf32, #tpu.memory_space<vmem>>, vector<1x8x128xf32>
    %440 = vector.shape_cast %439 : vector<1x8x128xf32> to vector<8x128xf32>
    %c22_152 = arith.constant 22 : index
    %441 = arith.index_cast %14 : i32 to index
    %c0_153 = arith.constant 0 : index
    %442 = vector.load %arg3[%c22_152, %441, %c0_153] : memref<30x8x128xf32, #tpu.memory_space<vmem>>, vector<1x8x128xf32>
    %443 = vector.shape_cast %442 : vector<1x8x128xf32> to vector<8x128xf32>
    %444 = arith.subf %440, %443 : vector<8x128xf32>
    %445 = arith.mulf %444, %444 : vector<8x128xf32>
    %c23 = arith.constant 23 : index
    %446 = arith.index_cast %14 : i32 to index
    %c0_154 = arith.constant 0 : index
    %447 = vector.load %arg2[%c23, %446, %c0_154] : memref<30x8x128xf32, #tpu.memory_space<vmem>>, vector<1x8x128xf32>
    %448 = vector.shape_cast %447 : vector<1x8x128xf32> to vector<8x128xf32>
    %c23_155 = arith.constant 23 : index
    %449 = arith.index_cast %14 : i32 to index
    %c0_156 = arith.constant 0 : index
    %450 = vector.load %arg3[%c23_155, %449, %c0_156] : memref<30x8x128xf32, #tpu.memory_space<vmem>>, vector<1x8x128xf32>
    %451 = vector.shape_cast %450 : vector<1x8x128xf32> to vector<8x128xf32>
    %452 = arith.subf %448, %451 : vector<8x128xf32>
    %453 = arith.mulf %452, %452 : vector<8x128xf32>
    %c24 = arith.constant 24 : index
    %454 = arith.index_cast %14 : i32 to index
    %c0_157 = arith.constant 0 : index
    %455 = vector.load %arg2[%c24, %454, %c0_157] : memref<30x8x128xf32, #tpu.memory_space<vmem>>, vector<1x8x128xf32>
    %456 = vector.shape_cast %455 : vector<1x8x128xf32> to vector<8x128xf32>
    %c24_158 = arith.constant 24 : index
    %457 = arith.index_cast %14 : i32 to index
    %c0_159 = arith.constant 0 : index
    %458 = vector.load %arg3[%c24_158, %457, %c0_159] : memref<30x8x128xf32, #tpu.memory_space<vmem>>, vector<1x8x128xf32>
    %459 = vector.shape_cast %458 : vector<1x8x128xf32> to vector<8x128xf32>
    %460 = arith.subf %456, %459 : vector<8x128xf32>
    %461 = arith.mulf %460, %460 : vector<8x128xf32>
    %c25 = arith.constant 25 : index
    %462 = arith.index_cast %14 : i32 to index
    %c0_160 = arith.constant 0 : index
    %463 = vector.load %arg2[%c25, %462, %c0_160] : memref<30x8x128xf32, #tpu.memory_space<vmem>>, vector<1x8x128xf32>
    %464 = vector.shape_cast %463 : vector<1x8x128xf32> to vector<8x128xf32>
    %c25_161 = arith.constant 25 : index
    %465 = arith.index_cast %14 : i32 to index
    %c0_162 = arith.constant 0 : index
    %466 = vector.load %arg3[%c25_161, %465, %c0_162] : memref<30x8x128xf32, #tpu.memory_space<vmem>>, vector<1x8x128xf32>
    %467 = vector.shape_cast %466 : vector<1x8x128xf32> to vector<8x128xf32>
    %468 = arith.subf %464, %467 : vector<8x128xf32>
    %469 = arith.mulf %468, %468 : vector<8x128xf32>
    %c26 = arith.constant 26 : index
    %470 = arith.index_cast %14 : i32 to index
    %c0_163 = arith.constant 0 : index
    %471 = vector.load %arg2[%c26, %470, %c0_163] : memref<30x8x128xf32, #tpu.memory_space<vmem>>, vector<1x8x128xf32>
    %472 = vector.shape_cast %471 : vector<1x8x128xf32> to vector<8x128xf32>
    %c26_164 = arith.constant 26 : index
    %473 = arith.index_cast %14 : i32 to index
    %c0_165 = arith.constant 0 : index
    %474 = vector.load %arg3[%c26_164, %473, %c0_165] : memref<30x8x128xf32, #tpu.memory_space<vmem>>, vector<1x8x128xf32>
    %475 = vector.shape_cast %474 : vector<1x8x128xf32> to vector<8x128xf32>
    %476 = arith.subf %472, %475 : vector<8x128xf32>
    %477 = arith.mulf %476, %476 : vector<8x128xf32>
    %c27 = arith.constant 27 : index
    %478 = arith.index_cast %14 : i32 to index
    %c0_166 = arith.constant 0 : index
    %479 = vector.load %arg2[%c27, %478, %c0_166] : memref<30x8x128xf32, #tpu.memory_space<vmem>>, vector<1x8x128xf32>
    %480 = vector.shape_cast %479 : vector<1x8x128xf32> to vector<8x128xf32>
    %c27_167 = arith.constant 27 : index
    %481 = arith.index_cast %14 : i32 to index
    %c0_168 = arith.constant 0 : index
    %482 = vector.load %arg3[%c27_167, %481, %c0_168] : memref<30x8x128xf32, #tpu.memory_space<vmem>>, vector<1x8x128xf32>
    %483 = vector.shape_cast %482 : vector<1x8x128xf32> to vector<8x128xf32>
    %484 = arith.subf %480, %483 : vector<8x128xf32>
    %485 = arith.mulf %484, %484 : vector<8x128xf32>
    %c28 = arith.constant 28 : index
    %486 = arith.index_cast %14 : i32 to index
    %c0_169 = arith.constant 0 : index
    %487 = vector.load %arg2[%c28, %486, %c0_169] : memref<30x8x128xf32, #tpu.memory_space<vmem>>, vector<1x8x128xf32>
    %488 = vector.shape_cast %487 : vector<1x8x128xf32> to vector<8x128xf32>
    %c28_170 = arith.constant 28 : index
    %489 = arith.index_cast %14 : i32 to index
    %c0_171 = arith.constant 0 : index
    %490 = vector.load %arg3[%c28_170, %489, %c0_171] : memref<30x8x128xf32, #tpu.memory_space<vmem>>, vector<1x8x128xf32>
    %491 = vector.shape_cast %490 : vector<1x8x128xf32> to vector<8x128xf32>
    %492 = arith.subf %488, %491 : vector<8x128xf32>
    %493 = arith.mulf %492, %492 : vector<8x128xf32>
    %c29 = arith.constant 29 : index
    %494 = arith.index_cast %14 : i32 to index
    %c0_172 = arith.constant 0 : index
    %495 = vector.load %arg2[%c29, %494, %c0_172] : memref<30x8x128xf32, #tpu.memory_space<vmem>>, vector<1x8x128xf32>
    %496 = vector.shape_cast %495 : vector<1x8x128xf32> to vector<8x128xf32>
    %c29_173 = arith.constant 29 : index
    %497 = arith.index_cast %14 : i32 to index
    %c0_174 = arith.constant 0 : index
    %498 = vector.load %arg3[%c29_173, %497, %c0_174] : memref<30x8x128xf32, #tpu.memory_space<vmem>>, vector<1x8x128xf32>
    %499 = vector.shape_cast %498 : vector<1x8x128xf32> to vector<8x128xf32>
    %500 = arith.subf %496, %499 : vector<8x128xf32>
    %501 = arith.mulf %500, %500 : vector<8x128xf32>
    %502 = arith.addf %349, %357 : vector<8x128xf32>
    %503 = arith.addf %365, %373 : vector<8x128xf32>
    %504 = arith.addf %381, %389 : vector<8x128xf32>
    %505 = arith.addf %397, %405 : vector<8x128xf32>
    %506 = arith.addf %413, %421 : vector<8x128xf32>
    %507 = arith.addf %429, %437 : vector<8x128xf32>
    %508 = arith.addf %445, %453 : vector<8x128xf32>
    %509 = arith.addf %461, %469 : vector<8x128xf32>
    %510 = arith.addf %477, %485 : vector<8x128xf32>
    %511 = arith.addf %493, %501 : vector<8x128xf32>
    %512 = arith.addf %502, %503 : vector<8x128xf32>
    %513 = arith.addf %504, %505 : vector<8x128xf32>
    %514 = arith.addf %506, %507 : vector<8x128xf32>
    %515 = arith.addf %508, %509 : vector<8x128xf32>
    %516 = arith.addf %510, %511 : vector<8x128xf32>
    %517 = arith.addf %512, %513 : vector<8x128xf32>
    %518 = arith.addf %514, %515 : vector<8x128xf32>
    %519 = arith.addf %517, %518 : vector<8x128xf32>
    %520 = arith.addf %519, %516 : vector<8x128xf32>
    %521 = arith.mulf %296, %520 : vector<8x128xf32>
    %522 = arith.addf %12, %341 : vector<8x128xf32>
    %523 = arith.addf %522, %521 : vector<8x128xf32>
    %c1_i32_175 = arith.constant 1 : i32
    %c0_176 = arith.constant 0 : index
    %c0_177 = arith.constant 0 : index
    %524 = vector.load %arg5[%c0_176, %c0_177] : memref<8x128xf32, #tpu.memory_space<vmem>>, vector<8x128xf32>
    %525 = arith.addf %524, %523 : vector<8x128xf32>
    %c0_178 = arith.constant 0 : index
    %c0_179 = arith.constant 0 : index
    %526 = vector.load %arg5[%c0_178, %c0_179] : memref<8x128xf32, #tpu.memory_space<vmem>>, vector<8x128xf32>
    tpu.vector_store %arg5[%c0_178, %c0_179], %525 {strides = array<i32>} : memref<8x128xf32, #tpu.memory_space<vmem>>, vector<8x128xf32>,
    %c0_i32_180 = arith.constant 0 : i32
    %527 = arith.cmpi eq, %arg1, %c0_i32_180 : i32
    %528 = arith.extui %527 : i1 to i32
    %c0_i32_181 = arith.constant 0 : i32
    %529 = arith.cmpi ne, %528, %c0_i32_181 : i32
    scf.if %529 {
      %c0_182 = arith.constant 0 : index
      %c0_183 = arith.constant 0 : index
      %530 = vector.load %arg5[%c0_182, %c0_183] : memref<8x128xf32, #tpu.memory_space<vmem>>, vector<8x128xf32>
      %cst_184 = arith.constant dense<0.000000e+00> : vector<8xf32>
      %531 = vector.multi_reduction <add>, %530, %cst_184 [1] : vector<8x128xf32> to vector<8xf32>
      %532 = vector.shape_cast %531 : vector<8xf32> to vector<8x1xf32>
      %cst_185 = arith.constant dense<0.000000e+00> : vector<1xf32>
      %533 = vector.multi_reduction <add>, %532, %cst_185 [0] : vector<8x1xf32> to vector<1xf32>
      %534 = vector.shape_cast %533 : vector<1xf32> to vector<1x1xf32>
      %cst_186 = arith.constant 5.000000e-01 : f32
      %535 = vector.broadcast %cst_186 : f32 to vector<1x1xf32>
      %536 = arith.mulf %534, %535 : vector<1x1xf32>
      %c0_187 = arith.constant 0 : index
      %c0_188 = arith.constant 0 : index
      %537 = vector.load %arg4[%c0_187, %c0_188] : memref<1x1xf32, #tpu.memory_space<vmem>>, vector<1x1xf32>
      tpu.vector_store %arg4[%c0_187, %c0_188], %536 {strides = array<i32>} : memref<1x1xf32, #tpu.memory_space<vmem>>, vector<1x1xf32>,
    } else {
    }
    return
  }
  func.func @transform_0(%arg0: i32, %arg1: i32) -> (i32, i32, i32) {
    %c1_i32 = arith.constant 1 : i32
    %0 = arith.muli %arg0, %c1_i32 : i32
    %1 = arith.addi %0, %arg1 : i32
    %c0_i32 = arith.constant 0 : i32
    %c0_i32_0 = arith.constant 0 : i32
    %c0_i32_1 = arith.constant 0 : i32
    return %c0_i32, %1, %c0_i32_0 : i32, i32, i32
  }
  func.func @transform_1(%arg0: i32, %arg1: i32) -> (i32, i32, i32) {
    %c1_i32 = arith.constant 1 : i32
    %0 = arith.muli %arg0, %c1_i32 : i32
    %1 = arith.addi %0, %arg1 : i32
    %c0_i32 = arith.constant 0 : i32
    %c0_i32_0 = arith.constant 0 : i32
    %c0_i32_1 = arith.constant 0 : i32
    return %c0_i32, %1, %c0_i32_0 : i32, i32, i32
  }
  func.func @transform_2(%arg0: i32, %arg1: i32) -> (i32, i32) {
    %c0_i32 = arith.constant 0 : i32
    %c0_i32_0 = arith.constant 0 : i32
    return %arg0, %c0_i32 : i32, i32
  }
}

</mosaic_0001>

<bundles_post_ra>
// kernel: tpu_custom_call.1
= control target key start
LH: loop header
LB: loop body
LE: loop exit
PB: predicated region body
PF: predicated region fallthrough
CT: control target
= control target key end

     0   :  { %7 = vsyncpa [#allocation4], 0  ;;  %s843_s0 = inlined_call_operand.hbm [shape: f32[30,8,128], index: 0, kind: input, shape index: {}]   ;;  %s844_s1 = inlined_call_operand.hbm [shape: f32[30,8,128], index: 1, kind: input, shape index: {}]   ;;  %s845_s2 = inlined_call_operand.hbm [shape: f32[1,1], index: 2, kind: output, shape index: {}]  }
   0x1   :  { %8 = vsyncpa [#allocation7], 0 }
   0x2   :  { %9 = vsyncpa [#allocation5], 0  ;;  %s651_s9 = smov [#allocation3]   ;;  %s579_s13 = scalar_lea.hbm %s843_s0, 3840 }
   0x3   :  { %s18_s10 = sshll.u32 %s651_s9, 4  ;;  %p580_p0 = scmp.ne.s32.totalorder %s843_s0, %s579_s13  ;;  %s19_s10 = int_to_ptr.vmem [resolvable:$true] %s18_s10 }
   0x4   :  { %p583_p1 = scmp.lt.u32.totalorder %s579_s13, %s843_s0 }
   0x6   :  { %p585_p2 = pnand %p583_p1, %p580_p0 }
   0x8   :  { %588 = shalt.err (!%p585_p2)
}
   0x9   :  { %s589_s18 = scalar_lea.vmem %s19_s10, 3840  ;;  %p594_p4 = scmp.lt.s32.totalorder %s19_s10, %s19_s10 }
   0xa   :  { %p590_p3 = scmp.ne.s32.totalorder %s19_s10, %s589_s18  ;;  %p595_p5 = scmp.lt.s32.totalorder %s589_s18, %s589_s18 }
   0xc   :  { %p596_p6 = por %p595_p5, %p594_p4 }
   0xe   :  { %p597_p7 = pnand %p596_p6, %p590_p3 }
  0x10   :  { %600 = shalt.err (!%p597_p7)
}
  0x11   :  { %s652_s19 = smov 128   ;;  %s653_s20 = smov 8  }
  0x12   :  { %24 = dma.hbm_to_vmem [thread:$0]  %s843_s0, 3840, %s19_s10, [#allocation4], %s652_s19, %s652_s19, %s653_s20  }
  0x13   :  { %s654_s23 = smov [#allocation6]   ;;  %s601_s27 = scalar_lea.hbm %s844_s1, 3840 }
  0x14   :  { %s33_s24 = sshll.u32 %s654_s23, 4  ;;  %p602_p8 = scmp.ne.s32.totalorder %s844_s1, %s601_s27  ;;  %s34_s24 = int_to_ptr.vmem [resolvable:$true] %s33_s24 }
  0x15   :  { %p605_p9 = scmp.lt.u32.totalorder %s601_s27, %s844_s1 }
  0x17   :  { %p607_p10 = pnand %p605_p9, %p602_p8 }
  0x19   :  { %610 = shalt.err (!%p607_p10)
}
  0x1a   :  { %s611_s4 = scalar_lea.vmem %s34_s24, 3840  ;;  %p616_p12 = scmp.lt.s32.totalorder %s34_s24, %s34_s24 }
  0x1b   :  { %p612_p11 = scmp.ne.s32.totalorder %s34_s24, %s611_s4  ;;  %p617_p13 = scmp.lt.s32.totalorder %s611_s4, %s611_s4 }
  0x1d   :  { %p618_p0 = por %p617_p13, %p616_p12 }
  0x1f   :  { %p619_p1 = pnand %p618_p0, %p612_p11 }
  0x21   :  { %622 = shalt.err (!%p619_p1)
}
  0x22   :  { %39 = dma.hbm_to_vmem [thread:$0]  %s844_s1, 3840, %s34_s24, [#allocation7], %s652_s19, %s652_s19, %s653_s20  }
  0x23   :  { %645 = dma.done.wait [#allocation4], 3840  }
  0x24   :  { %646 = vsyncadd [#allocation4], 4294963456 }
  0x25   :  { %647 = dma.done.wait [#allocation7], 3840  }
  0x26   :  { %648 = vsyncadd [#allocation7], 4294963456  ;;  %v53_v0 = vlaneseq  ;;  %v696_v10 = vld [vmem:[#allocation3 + $0x10] sm:$0xff]  ;;  %v698_v11 = vld [vmem:[#allocation3 + $0x18] sm:$0xff]  ;;  %s656_s1 = smov [#allocation8]   ;;  %vm485_vm10 = vcmask 0  }
  0x27   :  { %v700_v13 = vld [vmem:[#allocation3] sm:$0xff]  ;;  %v702_v14 = vld [vmem:[#allocation6 + $0x18] sm:$0xff]  ;;  %v126_v19 = vmul.f32 448.0, %v696_v10  ;;  %v711_v20 = vld [vmem:[#allocation3 + $0x30] sm:$0xff]  ;;  %v127_v23 = vmul.f32 448.0, %v698_v11  ;;  %s493_s6 = sshll.u32 %s656_s1, 4  ;;  %s494_s6 = int_to_ptr.vmem [resolvable:$true] %s493_s6 }
  0x28   :  { %v54_v1 = vshrl.u32 %v53_v0, 7  ;;  %v57_v2 = vand.u32 127, %v53_v0  ;;  %v704_v15 = vld [vmem:[#allocation3 + $0x8] sm:$0xff]  ;;  %v708_v17 = vld [vmem:[#allocation3 + $0x40] sm:$0xff]  ;;  %v713_v21 = vld [vmem:[#allocation3 + $0x38] sm:$0xff]  ;;  %v147_v28 = vmul.f32 448.0, %v702_v14  ;;  %p628_p3 = scmp.lt.s32.totalorder %s494_s6, %s494_s6 }
  0x29   :  { %v706_v16 = vld [vmem:[#allocation3 + $0x28] sm:$0xff]  ;;  %v715_v22 = vld [vmem:[#allocation6 + $0x8] sm:$0xff]  ;;  %v718_v24 = vld [vmem:[#allocation6 + $0x10] sm:$0xff]  ;;  %v122_v29 = vmul.f32 64.0, %v700_v13  ;;  %v124_v30 = vmul.f32 64.0, %v704_v15  ;;  %v186_v32 = vmul.f32 448.0, %v708_v17 }
  0x2a   :  { %v55_v3 = vmul.u32 128, %v54_v1  ;;  %v102_v25 = vld [vmem:[#allocation6 + $0x30] sm:$0xff]  ;;  %v106_v26 = vld [vmem:[#allocation6 + $0x40] sm:$0xff]  ;;  %v181_v31 = vmul.f32 64.0, %v706_v16  ;;  %v100_v34 = vld [vmem:[#allocation6 + $0x28] sm:$0xff]  ;;  %v128_v37 = vmul.f32 0.5, %v126_v19 }
  0x2b   :  { %v725_v33 = vld [vmem:[#allocation6] sm:$0xff]  ;;  %v104_v35 = vld [vmem:[#allocation6 + $0x38] sm:$0xff]  ;;  %v144_v38 = vmul.f32 64.0, %v715_v22  ;;  %v183_v39 = vmul.f32 64.0, %v711_v20  ;;  %v146_v40 = vmul.f32 448.0, %v718_v24  ;;  %v185_v41 = vmul.f32 448.0, %v713_v21 }
  0x2c   :  { %v58_v4 = vadd.s32 %v57_v2, %v55_v3  ;;  %v203_v42 = vmul.f32 64.0, %v102_v25  ;;  %v206_v43 = vmul.f32 448.0, %v106_v26  ;;  %v132_v46 = vmul.f32 0.5, %v127_v23  ;;  %s623_s7 = scalar_lea.vmem %s494_s6, 16  ;;  %s627_s8 = scalar_lea.vmem %s494_s6, 32 }
  0x2d   :  { %v152_v47 = vmul.f32 0.5, %v147_v28  ;;  %v142_v48 = vmul.f32 64.0, %v725_v33  ;;  %v191_v49 = vmul.f32 0.5, %v186_v32  ;;  %v201_v50 = vmul.f32 64.0, %v100_v34  ;;  %p624_p2 = scmp.ne.s32.totalorder %s494_s6, %s623_s7  ;;  %p629_p4 = scmp.lt.s32.totalorder %s627_s8, %s623_s7 }
  0x2e   :  { %v59_v5 = vcvt.s32.f32 %v58_v4  ;;  %v205_v51 = vmul.f32 448.0, %v104_v35  ;;  %v148_v56 = vmul.f32 0.5, %v146_v40  ;;  %v187_v57 = vmul.f32 0.5, %v185_v41 }
  0x2f   :  { %v211_v59 = vmul.f32 0.5, %v206_v43  ;;  %p630_p5 = por %p629_p4, %p628_p3 }
  0x30   :  { %v110_v6 = vadd.f32 0.5, %v59_v5  ;;  %v207_v3 = vmul.f32 0.5, %v205_v51 }
  0x31   :  { %p631_p6 = pnand %p630_p5, %p624_p2 }
  0x32   :  { %v111_v7 = vmul.f32 0.020408163, %v110_v6 }
  0x34   :  { %v112_v8 = vfloor.f32 %v111_v7 }
  0x36   :  { %v113_v9 = vmul.f32 49.0, %v112_v8 }
  0x38   :  { %v114_v12 = vsub.f32 %v59_v5, %v113_v9 }
  0x3a   :  { %v115_v18 = vadd.f32 0.5, %v114_v12 }
  0x3c   :  { %v116_v27 = vmul.f32 0.14285715, %v115_v18 }
  0x3e   :  { %v117_v36 = vfloor.f32 %v116_v27 }
  0x40   :  { %v118_v44 = vmul.f32 7.0, %v117_v36  ;;  %v121_v45 = vmul.f32 64.0, %v117_v36 }
  0x42   :  { %v119_v52 = vsub.f32 %v114_v12, %v118_v44  ;;  %v125_v53 = vadd.f32 %v124_v30, %v121_v45  ;;  %v145_v54 = vadd.f32 %v144_v38, %v121_v45  ;;  %v184_v55 = vadd.f32 %v183_v39, %v121_v45 }
  0x43   :  { %v204_v58 = vadd.f32 %v203_v42, %v121_v45 }
  0x44   :  { %v120_v60 = vmul.f32 64.0, %v119_v52  ;;  %v133_v61 = vsub.f32 %v125_v53, %v132_v46  ;;  %v139_v62 = vadd.f32 %v132_v46, %v125_v53  ;;  %v153_v63 = vsub.f32 %v145_v54, %v152_v47 }
  0x45   :  { %v159_v0 = vadd.f32 %v152_v47, %v145_v54  ;;  %v192_v1 = vsub.f32 %v184_v55, %v191_v49  ;;  %v198_v2 = vadd.f32 %v191_v49, %v184_v55  ;;  %v212_v18 = vsub.f32 %v204_v58, %v211_v59 }
  0x46   :  { %v123_v4 = vadd.f32 %v122_v29, %v120_v60  ;;  %v134_v5 = vmax.f32 %v133_v61, 0.0  ;;  %v140_v6 = vmax.f32 %v139_v62, 0.0  ;;  %v143_v7 = vadd.f32 %v142_v48, %v120_v60 }
  0x47   :  { %v154_v8 = vmax.f32 %v153_v63, 0.0  ;;  %v160_v9 = vmax.f32 %v159_v0, 0.0  ;;  %v182_v12 = vadd.f32 %v181_v31, %v120_v60  ;;  %v193_v38 = vmax.f32 %v192_v1, 0.0 }
  0x48   :  { %v129_v19 = vsub.f32 %v123_v4, %v128_v37  ;;  %v135_v23 = vmin.f32 %v134_v5, 448.0  ;;  %v136_v25 = vadd.f32 %v128_v37, %v123_v4  ;;  %v141_v26 = vmin.f32 %v140_v6, 448.0 }
  0x49   :  { %v149_v27 = vsub.f32 %v143_v7, %v148_v56  ;;  %v155_v28 = vmin.f32 %v154_v8, 448.0  ;;  %v156_v30 = vadd.f32 %v148_v56, %v143_v7  ;;  %v161_v32 = vmin.f32 %v160_v9, 448.0 }
  0x4a   :  { %v130_v34 = vmax.f32 %v129_v19, 0.0  ;;  %v137_v35 = vmax.f32 %v136_v25, 0.0  ;;  %v188_v36 = vsub.f32 %v182_v12, %v187_v57  ;;  %v172_v31 = vsub.f32 %v141_v26, %v135_v23 }
  0x4b   :  { %v150_v29 = vmax.f32 %v149_v27, 0.0  ;;  %v157_v39 = vmax.f32 %v156_v30, 0.0  ;;  %v164_v40 = vmax.f32 %v135_v23, %v155_v28  ;;  %v165_v41 = vmin.f32 %v141_v26, %v161_v32 }
  0x4c   :  { %v131_v42 = vmin.f32 %v130_v34, 448.0  ;;  %v138_v43 = vmin.f32 %v137_v35, 448.0  ;;  %v189_v44 = vmax.f32 %v188_v36, 0.0  ;;  %v175_v47 = vsub.f32 %v161_v32, %v155_v28 }
  0x4d   :  { %v151_v45 = vmin.f32 %v150_v29, 448.0  ;;  %v158_v46 = vmin.f32 %v157_v39, 448.0  ;;  %v168_v37 = vsub.f32 %v165_v41, %v164_v40  ;;  %v194_v49 = vmin.f32 %v193_v38, 448.0 }
  0x4e   :  { %v171_v48 = vsub.f32 %v138_v43, %v131_v42  ;;  %v195_v51 = vadd.f32 %v187_v57, %v182_v12  ;;  %v199_v52 = vmax.f32 %v198_v2, 0.0  ;;  %v190_v56 = vmin.f32 %v189_v44, 448.0 }
  0x4f   :  { %v162_v53 = vmax.f32 %v131_v42, %v151_v45  ;;  %v163_v54 = vmin.f32 %v138_v43, %v158_v46  ;;  %v174_v55 = vsub.f32 %v158_v46, %v151_v45  ;;  %v169_v61 = vmax.f32 %v168_v37, 1e-06  ;;  %v732_v42 = vld [vmem:[#allocation6 + $0x20] sm:$0xff] }
  0x50   :  { %v173_v62 = vmul.f32 %v172_v31, %v171_v48  ;;  %v196_v63 = vmax.f32 %v195_v51, 0.0  ;;  %v202_v0 = vadd.f32 %v201_v50, %v120_v60  ;;  %v200_v4 = vmin.f32 %v199_v52, 448.0  ;;  %v309_v37 = vld [vmem:[#allocation3 + $0x50] sm:$0xff]  ;;  %v316_v48 = vld [vmem:[#allocation3 + $0x58] sm:$0xff]  ;;  %v323_v52 = vld [vmem:[#allocation3 + $0x60] sm:$0xff] }
  0x51   :  { %v166_v1 = vsub.f32 %v163_v54, %v162_v53  ;;  %v213_v5 = vmax.f32 %v212_v18, 0.0  ;;  %v218_v6 = vadd.f32 %v211_v59, %v204_v58  ;;  %v176_v7 = vmul.f32 %v175_v47, %v174_v55  ;;  %v311_v47 = vld [vmem:[#allocation6 + $0x50] sm:$0xff]  ;;  %v325_v53 = vld [vmem:[#allocation6 + $0x60] sm:$0xff]  ;;  %v330_v54 = vld [vmem:[#allocation3 + $0x68] sm:$0xff] }
  0x52   :  { %v197_v8 = vmin.f32 %v196_v63, 448.0  ;;  %v208_v9 = vsub.f32 %v202_v0, %v207_v3  ;;  %v215_v19 = vadd.f32 %v207_v3, %v202_v0  ;;  %v231_v27 = vsub.f32 %v200_v4, %v194_v49  ;;  %v332_v55 = vld [vmem:[#allocation6 + $0x68] sm:$0xff] }
  0x53   :  { %v167_v23 = vmax.f32 %v166_v1, 1e-06  ;;  %v214_v25 = vmin.f32 %v213_v5, 448.0  ;;  %v219_v57 = vmax.f32 %v218_v6, 0.0  ;;  %v177_v34 = vadd.f32 %v176_v7, %v173_v62  ;;  %v344_v63 = vld [vmem:[#allocation3 + $0x78] sm:$0xff]  ;;  %v351_v5 = vld [vmem:[#allocation3 + $0x80] sm:$0xff] }
  0x54   :  { %v209_v2 = vmax.f32 %v208_v9, 0.0  ;;  %v216_v12 = vmax.f32 %v215_v19, 0.0  ;;  %v230_v26 = vsub.f32 %v197_v8, %v190_v56  ;;  %vm242_vm0 = vcmp.gt.f32.partialorder %v732_v42, 0.0  ;;  %v353_v6 = vld [vmem:[#allocation6 + $0x80] sm:$0xff]  ;;  %v358_v9 = vld [vmem:[#allocation3 + $0x88] sm:$0xff]  ;;  %v360_v19 = vld [vmem:[#allocation6 + $0x88] sm:$0xff] }
  0x55   :  { %v220_v28 = vmin.f32 %v219_v57, 448.0  ;;  %v223_v30 = vmax.f32 %v194_v49, %v214_v25  ;;  %v170_v32 = vmul.f32 %v169_v61, %v167_v23  ;;  %v738_v46 = vsel %vm242_vm0, %v718_v24, 1.0  ;;  %v318_v49 = vld [vmem:[#allocation6 + $0x58] sm:$0xff]  ;;  %v339_v61 = vld [vmem:[#allocation6 + $0x70] sm:$0xff]  ;;  %v365_v23 = vld [vmem:[#allocation3 + $0x90] sm:$0xff] }
  0x56   :  { %v210_v50 = vmin.f32 %v209_v2, 448.0  ;;  %v217_v60 = vmin.f32 %v216_v12, 448.0  ;;  %v232_v36 = vmul.f32 %v231_v27, %v230_v26  ;;  %v744_v51 = vsel %vm242_vm0, %v702_v14, 1.0  ;;  %v746_v24 = vld [vmem:[#allocation3 + $0x20] sm:$0xff]  ;;  %v372_v57 = vld [vmem:[#allocation3 + $0x98] sm:$0xff]  ;;  %v374_v2 = vld [vmem:[#allocation6 + $0x98] sm:$0xff] }
  0x57   :  { %v224_v35 = vmin.f32 %v200_v4, %v220_v28  ;;  %v234_v18 = vsub.f32 %v220_v28, %v214_v25  ;;  %v178_v29 = vsub.f32 %v177_v34, %v170_v32  ;;  %v312_v0 = vsub.f32 %v309_v37, %v311_v47  ;;  %v346_v4 = vld [vmem:[#allocation6 + $0x78] sm:$0xff]  ;;  %v367_v25 = vld [vmem:[#allocation6 + $0x90] sm:$0xff]  ;;  %v381_v27 = vld [vmem:[#allocation6 + $0xa0] sm:$0xff] }
  0x58   :  { %v221_v58 = vmax.f32 %v190_v56, %v210_v50  ;;  %v222_v59 = vmin.f32 %v197_v8, %v217_v60  ;;  %v233_v38 = vsub.f32 %v217_v60, %v210_v50  ;;  %v337_v56 = vld [vmem:[#allocation3 + $0x70] sm:$0xff]  ;;  %v319_v1 = vsub.f32 %v316_v48, %v318_v49  ;;  %v379_v26 = vld [vmem:[#allocation3 + $0xa0] sm:$0xff]  ;;  %v386_v28 = vld [vmem:[#allocation3 + $0xa8] sm:$0xff] }
  0x59   :  { %v227_v3 = vsub.f32 %v224_v35, %v223_v30  ;;  %567 = vrcp.f32 %v178_v29  ;;  %v326_v7 = vsub.f32 %v323_v52, %v325_v53  ;;  %v333_v14 = vsub.f32 %v330_v54, %v332_v55  ;;  %v388_v60 = vld [vmem:[#allocation6 + $0xa8] sm:$0xff]  ;;  %v393_v35 = vld [vmem:[#allocation3 + $0xb0] sm:$0xff]  ;;  %v407_v29 = vld [vmem:[#allocation3 + $0xc0] sm:$0xff] }
  0x5a   :  { %v225_v39 = vsub.f32 %v222_v59, %v221_v58  ;;  %v235_v40 = vmul.f32 %v234_v18, %v233_v38  ;;  %v340_v8 = vsub.f32 %v337_v56, %v339_v61  ;;  %v753_v34 = vmul.f32 %v746_v24, %v746_v24  ;;  %v395_v18 = vld [vmem:[#allocation6 + $0xb0] sm:$0xff]  ;;  %v400_v38 = vld [vmem:[#allocation3 + $0xb8] sm:$0xff] }
  0x5b   :  { %v228_v41 = vmax.f32 %v227_v3, 1e-06  ;;  %vm272_vm1 = vcmp.eq.f32.partialorder %v738_v46, inf  ;;  %v275_v50 = vand.u32 2147483648, %v738_v46  ;;  %v313_v59 = vmul.f32 %v312_v0, %v312_v0  ;;  %v402_v3 = vld [vmem:[#allocation6 + $0xb8] sm:$0xff]  ;;  %v416_v37 = vld [vmem:[#allocation6 + $0xc8] sm:$0xff] }
  0x5c   :  { %v226_v43 = vmax.f32 %v225_v39, 1e-06  ;;  %v236_v31 = vadd.f32 %v235_v40, %v232_v36  ;;  %v347_v36 = vsub.f32 %v344_v63, %v346_v4  ;;  %v327_v39 = vmul.f32 %v326_v7, %v326_v7 }
  0x5d   :  { %v334_v40 = vmul.f32 %v333_v14, %v333_v14  ;;  %vm274_vm3 = vcmp.eq.f32.partialorder %v738_v46, 0.0  ;;  %vm290_vm4 = vcmp.eq.f32.partialorder %v744_v51, inf  ;;  %v368_v49 = vsub.f32 %v365_v23, %v367_v25 }
  0x5e   :  { %v229_v44 = vmul.f32 %v228_v41, %v226_v43  ;;  %v341_v41 = vmul.f32 %v340_v8, %v340_v8  ;;  %v354_v43 = vsub.f32 %v351_v5, %v353_v6  ;;  %v375_v52 = vsub.f32 %v372_v57, %v374_v2  ;;  %v421_v5 = vld [vmem:[#allocation3 + $0xd0] sm:$0xff]  ;;  %v423_v6 = vld [vmem:[#allocation6 + $0xd0] sm:$0xff]  ;;  %v428_v8 = vld [vmem:[#allocation3 + $0xd8] sm:$0xff] }
  0x5f   :  { %v382_v54 = vsub.f32 %v379_v26, %v381_v27  ;;  %v389_v55 = vsub.f32 %v386_v28, %v388_v60  ;;  %v396_v56 = vsub.f32 %v393_v35, %v395_v18  ;;  %v369_v14 = vmul.f32 %v368_v49, %v368_v49  ;;  %v437_v2 = vld [vmem:[#allocation6 + $0xe0] sm:$0xff]  ;;  %v442_v26 = vld [vmem:[#allocation3 + $0xe8] sm:$0xff]  ;;  %v444_v27 = vld [vmem:[#allocation6 + $0xe8] sm:$0xff] }
  0x60   :  { %v237_v45 = vsub.f32 %v236_v31, %v229_v44  ;;  %v409_v31 = vld [vmem:[#allocation6 + $0xc0] sm:$0xff]  ;;  %v376_v23 = vmul.f32 %v375_v52, %v375_v52  ;;  %vm292_vm5 = vcmp.eq.f32.partialorder %v744_v51, 0.0  ;;  %v655_v48 = vmov 0.0  }
  0x61   :  { %v410_v63 = vsub.f32 %v407_v29, %v409_v31  ;;  %v383_v25 = vmul.f32 %v382_v54, %v382_v54  ;;  %v390_v57 = vmul.f32 %v389_v55, %v389_v55  ;;  %v397_v28 = vmul.f32 %v396_v56, %v396_v56 }
  0x62   :  { %569 = vrcp.f32 %v237_v45  ;;  %v414_v45 = vld [vmem:[#allocation3 + $0xc8] sm:$0xff]  ;;  %v451_v52 = vadd.f32 %v376_v23, %v369_v14 }
  0x63   :  { %571 = vrsqrt.f32 %v738_v46  ;;  %v568_v62 = vpop.eup %567  ;;  %v417_v0 = vsub.f32 %v414_v45, %v416_v37  ;;  %v411_v60 = vmul.f32 %v410_v63, %v410_v63  ;;  %v448_v45 = vadd.f32 %v334_v40, %v327_v39 }
  0x64   :  { %573 = vrsqrt.f32 %v744_v51  ;;  %v749_v12 = vmul.f32 %v568_v62, %v170_v32  ;;  %v320_v32 = vmul.f32 %v319_v1, %v319_v1  ;;  %v403_v62 = vsub.f32 %v400_v38, %v402_v3 }
  0x65   :  { %v418_v35 = vmul.f32 %v417_v0, %v417_v0  ;;  %v424_v38 = vsub.f32 %v421_v5, %v423_v6 }
  0x66   :  { %v447_v31 = vadd.f32 %v320_v32, %v313_v59 }
  0x67   :  { %v454_v55 = vadd.f32 %v418_v35, %v411_v60  ;;  %v425_v32 = vmul.f32 %v424_v38, %v424_v38 }
  0x68   :  { %v457_v56 = vadd.f32 %v448_v45, %v447_v31 }
  0x6c   :  { %v570_v30 = vpop.eup %569 }
  0x6d   :  { %v757_v58 = vmul.f32 %v570_v30, %v229_v44  ;;  %v572_v47 = vpop.eup %571  ;;  %v361_v44 = vsub.f32 %v358_v9, %v360_v19  ;;  %v430_v9 = vld [vmem:[#allocation6 + $0xd8] sm:$0xff]  ;;  %v435_v19 = vld [vmem:[#allocation3 + $0xe0] sm:$0xff]  ;;  %v404_v30 = vmul.f32 %v403_v62, %v403_v62 }
  0x6e   :  { %v271_v4 = vmul.f32 %v572_v47, %v738_v46  ;;  %v574_v7 = vpop.eup %573  ;;  %v431_v3 = vsub.f32 %v428_v8, %v430_v9  ;;  %v438_v29 = vsub.f32 %v435_v19, %v437_v2 }
  0x6f   :  { %vm761_vm2 = vcmp.lt.f32.partialorder %v749_v12, %v757_v58  ;;  %v453_v54 = vadd.f32 %v404_v30, %v397_v28 }
  0x70   :  { %v248_v53 = vsel %vm761_vm2, %v713_v21, %v696_v10  ;;  %v249_v61 = vsel %vm761_vm2, %v708_v17, %v698_v11  ;;  %v348_v21 = vmul.f32 %v347_v36, %v347_v36  ;;  %v355_v11 = vmul.f32 %v354_v43, %v354_v43 }
  0x71   :  { %v777_v1 = vsel %vm242_vm0, %v248_v53, 1.0  ;;  %v782_v10 = vsel %vm242_vm0, %v249_v61, 1.0  ;;  %v362_v17 = vmul.f32 %v361_v44, %v361_v44  ;;  %v273_v18 = vsel %vm272_vm1, %v738_v46, %v271_v4 }
  0x72   :  { %575 = vrsqrt.f32 %v777_v1  ;;  %v289_v36 = vmul.f32 %v574_v7, %v744_v51  ;;  %v445_v43 = vsub.f32 %v442_v26, %v444_v27  ;;  %v246_v37 = vsel %vm761_vm2, %v706_v16, %v700_v13 }
  0x73   :  { %577 = vrsqrt.f32 %v782_v10  ;;  %v247_v47 = vsel %vm761_vm2, %v711_v20, %v704_v15  ;;  %v449_v44 = vadd.f32 %v348_v21, %v341_v41  ;;  %v450_v49 = vadd.f32 %v362_v17, %v355_v11 }
  0x74   :  { %v452_v53 = vadd.f32 %v390_v57, %v383_v25  ;;  %v276_v59 = vsel %vm274_vm3, %v275_v50, %v273_v18  ;;  %v291_v13 = vsel %vm290_vm4, %v744_v51, %v289_v36  ;;  %v293_v16 = vand.u32 2147483648, %v744_v51  ;;  %v89_v50 = vld [vmem:[#allocation3 + $0x48] sm:$0xff] }
  0x75   :  { %v255_v15 = vsub.f32 %v246_v37, %v725_v33  ;;  %v257_v20 = vsub.f32 %v247_v47, %v715_v22  ;;  %v432_v39 = vmul.f32 %v431_v3, %v431_v3  ;;  %v439_v40 = vmul.f32 %v438_v29, %v438_v29 }
  0x76   :  { %v446_v41 = vmul.f32 %v445_v43, %v445_v43  ;;  %v458_v61 = vadd.f32 %v450_v49, %v449_v44  ;;  %vm264_vm6 = vcmp.eq.f32.partialorder %v777_v1, inf  ;;  %v267_v62 = vand.u32 2147483648, %v777_v1 }
  0x77   :  { %v459_v63 = vadd.f32 %v452_v53, %v451_v52  ;;  %v460_v0 = vadd.f32 %v454_v55, %v453_v54  ;;  %vm266_vm7 = vcmp.eq.f32.partialorder %v777_v1, 0.0  ;;  %vm282_vm8 = vcmp.eq.f32.partialorder %v782_v10, inf }
  0x78   :  { %v285_v22 = vand.u32 2147483648, %v782_v10  ;;  %v256_v33 = vmul.f32 %v255_v15, %v255_v15  ;;  %v258_v5 = vmul.f32 %v257_v20, %v257_v20  ;;  %vm284_vm9 = vcmp.eq.f32.partialorder %v782_v10, 0.0 }
  0x79   :  { %v241_v7 = vsel %vm761_vm2, %v757_v58, %v749_v12  ;;  %v250_v11 = vsel %vm761_vm2, %v89_v50, %v746_v24  ;;  %v294_v14 = vsel %vm292_vm5, %v293_v16, %v291_v13  ;;  %v252_v8 = vmul.f32 %v89_v50, %v89_v50 }
  0x7a   :  { %v455_v23 = vadd.f32 %v432_v39, %v425_v32  ;;  %v456_v2 = vadd.f32 %v446_v41, %v439_v40  ;;  %v462_v26 = vadd.f32 %v458_v61, %v457_v56  ;;  %v259_v27 = vadd.f32 %v258_v5, %v256_v33 }
  0x7b   :  { %v299_v58 = vsub.f32 %v250_v11, %v241_v7  ;;  %v463_v28 = vadd.f32 %v460_v0, %v459_v63  ;;  %v560_v24 = vsel %vm242_vm0, 1.0, %v655_v48  ;;  %v253_v30 = vadd.f32 %v252_v8, %v753_v34 }
  0x7c   :  { %v576_v46 = vpop.eup %575  ;;  %v245_v51 = vsub.f32 1.0, %v560_v24  ;;  %v461_v35 = vadd.f32 %v456_v2, %v455_v23 }
  0x7d   :  { %v578_v4 = vpop.eup %577  ;;  %v263_v21 = vmul.f32 %v576_v46, %v777_v1  ;;  %v300_v36 = vmul.f32 %v299_v58, %v299_v58  ;;  %v464_v38 = vadd.f32 %v463_v28, %v462_v26 }
  0x7e   :  { %v281_v6 = vmul.f32 %v578_v4, %v782_v10  ;;  %v254_v3 = vmul.f32 %v253_v30, %v245_v51 }
  0x7f   :  { %v265_v17 = vsel %vm264_vm6, %v777_v1, %v263_v21  ;;  %v301_v43 = vmul.f32 %v560_v24, %v300_v36  ;;  %v465_v45 = vadd.f32 %v464_v38, %v461_v35 }
  0x80   :  { %v268_v9 = vsel %vm266_vm7, %v267_v62, %v265_v17  ;;  %v283_v19 = vsel %vm282_vm8, %v782_v10, %v281_v6  ;;  %v260_v10 = vmul.f32 %v560_v24, %v259_v27  ;;  %v305_v47 = vmul.f32 0.5, %v254_v3 }
  0x81   :  { %v277_v25 = vsub.f32 %v268_v9, %v276_v59  ;;  %v286_v57 = vsel %vm284_vm9, %v285_v22, %v283_v19  ;;  %v466_v42 = vmul.f32 %v560_v24, %v465_v45 }
  0x82   :  { %v295_v12 = vsub.f32 %v286_v57, %v294_v14 }
  0x83   :  { %v278_v1 = vmul.f32 %v277_v25, %v277_v25 }
  0x84   :  { %v296_v60 = vmul.f32 %v295_v12, %v295_v12 }
  0x86   :  { %v297_v18 = vadd.f32 %v296_v60, %v278_v1 }
  0x88   :  { %v298_v29 = vmul.f32 %v560_v24, %v297_v18 }
  0x8a   :  { %v302_v31 = vadd.f32 %v298_v29, %v260_v10 }
  0x8c   :  { %v303_v37 = vmul.f32 5.0, %v302_v31 }
  0x8e   :  { %v304_v44 = vadd.f32 %v303_v37, %v301_v43 }
  0x90   :  { %v306_v49 = vadd.f32 %v305_v47, %v304_v44 }
  0x92   :  { %v468_v52 = vadd.f32 %v466_v42, %v306_v49 }
  0x94   :  { %476 = vadd.xlane.f32.xlu0 %v468_v52 }
 0x121   :  { %v477_v53 = vpop.xlane.xlu0 %476 }
 0x122   :  { %v478_v34 = vrot.slane %v477_v53, 4 }
 0x124   :  { %v479_v54 = vadd.f32 %v478_v34, %v477_v53 }
 0x126   :  { %v480_v55 = vrot.slane %v479_v54, 2 }
 0x128   :  { %v481_v59 = vadd.f32 %v480_v55, %v479_v54 }
 0x12a   :  { %v482_v13 = vrot.slane %v481_v59, 1 }
 0x12c   :  { %v483_v16 = vadd.f32 %v482_v13, %v481_v59 }
 0x12e   :  { %v484_v15 = vmul.f32 0.5, %v483_v16 }
 0x130   :  { %486 = vst.msk [vmem:[#allocation8] sm:$0x1] %vm485_vm10, %v484_v15 }
 0x131   :  { %634 = shalt.err (!%p631_p6)
}
 0x132   :  { %s635_s11 = scalar_lea.hbm %s845_s2, 16 }
 0x133   :  { %p636_p7 = scmp.ne.s32.totalorder %s845_s2, %s635_s11  ;;  %p639_p8 = scmp.lt.u32.totalorder %s635_s11, %s845_s2 }
 0x135   :  { %p641_p9 = pnand %p639_p8, %p636_p7 }
 0x137   :  { %644 = shalt.err (!%p641_p9)
}
 0x138   :  { %496 = dma.vmem_to_hbm [thread:$0]  %s494_s6, 16, %s845_s2, [#allocation5]  }
 0x139   :  { %649 = dma.done.wait [#allocation5], 16  }
 0x13a   :  { %650 = vsyncadd [#allocation5], 4294967280 }
 0x13b   :  { %500 = vsyncpa [#allocation4], 1 }
 0x13c   :  { %501 = vsyncpa [#allocation7], 1 }
 0x13d   :  { %502 = vsyncpa [#allocation5], 1 }

</bundles_post_ra>
